<compile_context>
chip_gen: v6e
topology: v6e:2x2x1
jax: 0.10.0
libtpu: 0.0.40
codegen_flags: <defaults>
</compile_context>

<pallas_src>
import numpy as np
import jax
import jax.numpy as jnp
from jax.experimental import pallas as pl
from jax.experimental.pallas import tpu as pltpu

_LANE = 128


# --------------------------------------------------------------------------------------
# Tiling helpers
# --------------------------------------------------------------------------------------
def _round_up(n, m):
    return ((n + m - 1) // m) * m


def _tile_bytes(r, c, itemsize=4):
    """VMEM footprint of an (r, c) f32 block after (8, 128) tiling."""
    return _round_up(max(int(r), 1), 8) * _round_up(max(int(c), 1), _LANE) * itemsize


def _vmem_limit(per_step_bytes):
    """Explicit VMEM budget: double-buffered blocks + compiler scratch margin.
    Kept well under v7x's 64 MiB physical VMEM."""
    return int(min(max(2 * per_step_bytes + (4 << 20), 8 << 20), 32 << 20))


def _choose_row_tile(rows_padded, max_tile=2048):
    """Largest row (lane-axis) tile dividing rows_padded, preferring a grid of >= 2 steps
    so both v7x TensorCores get work."""
    candidates = [t for t in (2048, 1024, 512, 256, 128)
                  if t <= max_tile and rows_padded % t == 0]
    for t in candidates:
        if rows_padded // t >= 2:
            return t
    return candidates[0]


def _pad_rows(x2, rows_padded):
    rows = x2.shape[1]
    if rows == rows_padded:
        return x2
    return jnp.pad(x2, ((0, 0), (0, rows_padded - rows)))


# --------------------------------------------------------------------------------------
# Fused multi-input pointwise (1x1) convolution kernel, channels-first:
#   y = relu?( sum_k wT_k @ x_k + b )   with output block (Cout, rb) -> lane-dense stores.
# --------------------------------------------------------------------------------------
def _make_conv_kernel(n_inputs, relu):
    if n_inputs == 1:
        def kernel(x_ref, w_ref, b_ref, o_ref):
            y = jnp.dot(w_ref[...], x_ref[...], preferred_element_type=jnp.float32)
            y = y + b_ref[...]
            if relu:
                y = jnp.maximum(y, 0.0)
            o_ref[...] = y.astype(o_ref.dtype)
    else:
        def kernel(x1_ref, w1_ref, x2_ref, w2_ref, b_ref, o_ref):
            y = jnp.dot(w1_ref[...], x1_ref[...], preferred_element_type=jnp.float32)
            y = y + jnp.dot(w2_ref[...], x2_ref[...], preferred_element_type=jnp.float32)
            y = y + b_ref[...]
            if relu:
                y = jnp.maximum(y, 0.0)
            o_ref[...] = y.astype(o_ref.dtype)
    return kernel


def pw_conv(xs_ws, bias, relu=False):
    """Fused multi-input 1x1 convolution.

    xs_ws: list of (x [Cin_k, B, H, W], wT [Cout, Cin_k]); bias: [Cout].
    Returns relu?(sum_k wT_k @ x_k + bias) with shape [Cout, B, H, W].
    """
    assert len(xs_ws) in (1, 2)
    _, B, H, W = xs_ws[0][0].shape
    Cout = xs_ws[0][1].shape[0]
    dtype = xs_ws[0][0].dtype
    rows = B * H * W
    rows_p = _round_up(rows, _LANE)
    rb = _choose_row_tile(rows_p)
    grid = (rows_p // rb,)

    args, in_specs = [], []
    per_step = _tile_bytes(Cout, rb)                       # output block
    for x, wT in xs_ws:
        Cin = x.shape[0]
        args.append(_pad_rows(x.reshape(Cin, rows), rows_p))
        in_specs.append(pl.BlockSpec((Cin, rb), lambda i: (0, i)))
        args.append(wT)
        in_specs.append(pl.BlockSpec((Cout, Cin), lambda i: (0, 0)))
        per_step += _tile_bytes(Cin, rb) + _tile_bytes(Cout, Cin)
    args.append(bias.reshape(Cout, 1))
    in_specs.append(pl.BlockSpec((Cout, 1), lambda i: (0, 0)))
    per_step += _tile_bytes(Cout, 1)

    out = pl.pallas_call(
        _make_conv_kernel(len(xs_ws), relu),
        out_shape=jax.ShapeDtypeStruct((Cout, rows_p), dtype),
        grid_spec=pltpu.PrefetchScalarGridSpec(
            num_scalar_prefetch=0,
            grid=grid,
            in_specs=in_specs,
            out_specs=pl.BlockSpec((Cout, rb), lambda i: (0, i)),
        ),
        compiler_params=pltpu.CompilerParams(
            dimension_semantics=("parallel",),
            vmem_limit_bytes=_vmem_limit(per_step),
        ),
    )(*args)
    return out[:, :rows].reshape(Cout, B, H, W)


# --------------------------------------------------------------------------------------
# s_mask fusion kernel (exact math from EfficientUNet.forward, dual branch):
#   s_score = sigmoid(i[nb:3nb])
#   mix       = s_score[nb:2nb] * j[2nb:3nb] + (1 - s_score[nb:2nb]) * j[nb:2nb]
#   domain_a  = s_score[:nb]    * j[nb:2nb]
#   domain_at = s_score[nb:2nb] * j[2nb:3nb]
# Pure elementwise -> runs on a flat (st, 128)-tiled element stream (lane-dense at any C).
# --------------------------------------------------------------------------------------
def _smask_kernel(i_mid_ref, i_top_ref, j_mid_ref, j_top_ref, mix_ref, da_ref, dat_ref):
    s_mid = jax.nn.sigmoid(i_mid_ref[...])   # = s_score[:nb]
    s_top = jax.nn.sigmoid(i_top_ref[...])   # = s_score[nb:2nb]
    j_mid = j_mid_ref[...]
    j_top = j_top_ref[...]
    mix_ref[...] = s_top * j_top + (1.0 - s_top) * j_mid
    da_ref[...] = s_mid * j_mid
    dat_ref[...] = s_top * j_top


def _flat_pad_tile(n):
    """Flat element-stream tiling: returns (padded_length, sublane_tile)."""
    if n >= 2 * 512 * _LANE:
        st = 512
    elif n > 256 * _LANE:
        st = 256
    else:
        st = _round_up(_round_up(max(n, 1), _LANE) // _LANE, 8)
        return st * _LANE, st
    return _round_up(n, st * _LANE), st


def smask_fusion(i_mid, i_top, j_mid, j_top):
    shape = i_mid.shape              # (C, nb, H, W)
    n = int(np.prod(shape))
    n_pad, st = _flat_pad_tile(n)
    S = n_pad // _LANE
    grid = (S // st,)

    def prep(t):
        f = t.reshape(-1)
        if n_pad != n:
            f = jnp.pad(f, (0, n_pad - n))
        return f.reshape(S, _LANE)

    spec = pl.BlockSpec((st, _LANE), lambda i: (i, 0))
    per_step = 7 * _tile_bytes(st, _LANE)
    mix, da, dat = pl.pallas_call(
        _smask_kernel,
        out_shape=tuple(jax.ShapeDtypeStruct((S, _LANE), i_mid.dtype) for _ in range(3)),
        grid_spec=pltpu.PrefetchScalarGridSpec(
            num_scalar_prefetch=0,
            grid=grid,
            in_specs=[spec, spec, spec, spec],
            out_specs=(spec, spec, spec),
        ),
        compiler_params=pltpu.CompilerParams(
            dimension_semantics=("parallel",),
            vmem_limit_bytes=_vmem_limit(per_step),
        ),
    )(prep(i_mid), prep(i_top), prep(j_mid), prep(j_top))
    unflat = lambda t: t.reshape(-1)[:n].reshape(shape)
    return unflat(mix), unflat(da), unflat(dat)


# --------------------------------------------------------------------------------------
# InteractionBranch fused kernel (channels-first):
#   fused = seg + Conv1x1(recon)            (recon_adjust: 1 -> Cs, with bias)
#   h     = ReLU(BN_eval(W1 @ fused))       (Conv 1x1 Cs -> 32, no bias; BN folded)
#   out   = W2 @ h + b2                     (Conv 1x1 32 -> Cs, with bias)
# --------------------------------------------------------------------------------------
def _interaction_kernel(seg_ref, rec_ref, wr_ref, br_ref, w1_ref, bn_s_ref, bn_t_ref,
                        w2_ref, b2_ref, o_ref):
    fused = seg_ref[...] + wr_ref[...] * rec_ref[...] + br_ref[...]
    h = jnp.dot(w1_ref[...], fused, preferred_element_type=jnp.float32)
    h = jnp.maximum(h * bn_s_ref[...] + bn_t_ref[...], 0.0)
    out = jnp.dot(w2_ref[...], h, preferred_element_type=jnp.float32) + b2_ref[...]
    o_ref[...] = out.astype(o_ref.dtype)


def interaction_branch(p, seg, recon):
    """seg: [Cs, B, H, W], recon: [1, B, H, W] (channels-first)."""
    Cs, B, H, W = seg.shape
    hidden = p["w1T"].shape[0]
    rows = B * H * W
    rows_p = _round_up(rows, _LANE)
    rb = _choose_row_tile(rows_p)
    grid = (rows_p // rb,)

    per_step = (2 * _tile_bytes(Cs, rb) + _tile_bytes(1, rb) + _tile_bytes(hidden, rb)
                + _tile_bytes(hidden, Cs) + _tile_bytes(Cs, hidden)
                + 3 * _tile_bytes(Cs, 1) + 2 * _tile_bytes(hidden, 1))
    out = pl.pallas_call(
        _interaction_kernel,
        out_shape=jax.ShapeDtypeStruct((Cs, rows_p), seg.dtype),
        grid_spec=pltpu.PrefetchScalarGridSpec(
            num_scalar_prefetch=0,
            grid=grid,
            in_specs=[
                pl.BlockSpec((Cs, rb), lambda i: (0, i)),        # seg
                pl.BlockSpec((1, rb), lambda i: (0, i)),         # recon
                pl.BlockSpec((Cs, 1), lambda i: (0, 0)),         # recon_adjust weight (T)
                pl.BlockSpec((Cs, 1), lambda i: (0, 0)),         # recon_adjust bias
                pl.BlockSpec((hidden, Cs), lambda i: (0, 0)),    # interaction conv1 weight (T)
                pl.BlockSpec((hidden, 1), lambda i: (0, 0)),     # BN scale
                pl.BlockSpec((hidden, 1), lambda i: (0, 0)),     # BN shift
                pl.BlockSpec((Cs, hidden), lambda i: (0, 0)),    # interaction conv2 weight (T)
                pl.BlockSpec((Cs, 1), lambda i: (0, 0)),         # interaction conv2 bias
            ],
            out_specs=pl.BlockSpec((Cs, rb), lambda i: (0, i)),
        ),
        compiler_params=pltpu.CompilerParams(
            dimension_semantics=("parallel",),
            vmem_limit_bytes=_vmem_limit(per_step),
        ),
    )(
        _pad_rows(seg.reshape(Cs, rows), rows_p),
        _pad_rows(recon.reshape(1, rows), rows_p),
        p["wrT"], p["brT"], p["w1T"], p["bn_scale"], p["bn_shift"], p["w2T"], p["b2T"],
    )
    return out[:, :rows].reshape(Cs, B, H, W)


# --------------------------------------------------------------------------------------
# Plain-JAX glue (resampling) and synthetic DualUnet stand-ins (channels-first [C,B,H,W]).
# --------------------------------------------------------------------------------------
def avgpool2(x):
    C, B, H, W = x.shape
    return x.reshape(C, B, H // 2, 2, W // 2, 2).mean(axis=(3, 5))


def up2(x):
    return jnp.repeat(jnp.repeat(x, 2, axis=2), 2, axis=3)


def encoder_forward(p, x):
    # TODO(synk): efficientnet-b2 encoder (segmentation_models_pytorch) source not provided;
    # synthetic multi-scale pyramid stand-in built from Pallas pointwise convs.
    f0 = x
    f1 = pw_conv([(avgpool2(f0), p["e1"][0])], p["e1"][1], relu=True)
    f2 = pw_conv([(avgpool2(f1), p["e2"][0])], p["e2"][1], relu=True)
    f3 = pw_conv([(avgpool2(f2), p["e3"][0])], p["e3"][1], relu=True)
    return [f0, f1, f2, f3]


def decoder_forward(p, feats):
    # TODO(synk): smp UnetDecoder source not provided; synthetic upsample + skip decoder
    # stand-in.  Each level is a single fused Pallas kernel:
    #   d = relu(W_up @ up2(low) + W_skip @ skip + (b_up + b_skip))
    f0, f1, f2, f3 = feats
    d2 = pw_conv([(up2(f3), p["d2u"][0]), (f2, p["d2s"][0])],
                 p["d2u"][1] + p["d2s"][1], relu=True)
    d1 = pw_conv([(up2(d2), p["d1u"][0]), (f1, p["d1s"][0])],
                 p["d1u"][1] + p["d1s"][1], relu=True)
    d0 = pw_conv([(up2(d1), p["d0u"][0]), (f0, p["d0s"][0])],
                 p["d0u"][1] + p["d0s"][1], relu=True)
    return d0


# --------------------------------------------------------------------------------------
# EfficientUNet.forward (dual / D path exercises the in-file semantics exactly).
# --------------------------------------------------------------------------------------
def efficient_unet_forward(params, x_nchw, dual=True, D=True):
    to_cf = lambda t: jnp.transpose(t, (1, 0, 2, 3))     # NCHW -> CBHW
    to_nchw = lambda t: jnp.transpose(t, (1, 0, 2, 3))   # CBHW -> NCHW
    x = to_cf(x_nchw)
    outputs = {}

    if dual:
        nb = x.shape[1] // 4
        x_enc = x[:, :3 * nb]
        enc_features = encoder_forward(params["encoder"], x_enc)
        domain_features = encoder_forward(params["encoder_dual"], x_enc)

        feat_a, feat_mix, domain_a, domain_at = [], [], [], []
        for i, j in zip(enc_features, domain_features):
            feat_a.append(j[:, :nb])
            mix, da, dat = smask_fusion(i[:, nb:2 * nb], i[:, 2 * nb:3 * nb],
                                        j[:, nb:2 * nb], j[:, 2 * nb:3 * nb])
            feat_mix.append(mix)
            domain_a.append(da)
            domain_at.append(dat)

        if D:
            # Batch the two decoder_dual passes (identical weights) along the batch axis.
            feat_cat = [jnp.concatenate([a, m], axis=1) for a, m in zip(feat_a, feat_mix)]
            dec_cat = decoder_forward(params["decoder_dual"], feat_cat)
            recon_cat = pw_conv([(dec_cat, params["recon_head"][0])], params["recon_head"][1])
            recon_a = recon_cat[:, :nb]
            recon_mix = recon_cat[:, nb:]
            outputs["a"] = to_nchw(recon_a)
            outputs["a_prime_mix"] = to_nchw(recon_mix)
        else:
            dec_a = decoder_forward(params["decoder_dual"], feat_a)
            outputs["a"] = to_nchw(
                pw_conv([(dec_a, params["recon_head"][0])], params["recon_head"][1]))

        outputs["domain_a"] = [to_nchw(t) for t in domain_a]
        outputs["domain_at"] = [to_nchw(t) for t in domain_at]
    else:
        enc_features = encoder_forward(params["encoder"], x)

    decoder_output = decoder_forward(params["decoder"], enc_features)
    masks_cf = pw_conv([(decoder_output, params["seg_head"][0])], params["seg_head"][1])
    outputs["enc_features"] = [to_nchw(f) for f in enc_features]
    outputs["masks"] = to_nchw(masks_cf)

    if dual and D:
        nb = x.shape[1] // 4
        # Reuse the channels-first intermediates directly (no NCHW round trip).
        outputs["joint_output"] = to_nchw(
            interaction_branch(params["interaction"], masks_cf[:, :nb], recon_mix))
    return outputs


# --------------------------------------------------------------------------------------
# Deterministic parameter initialization (weights stored transposed: wT [Cout, Cin]).
# --------------------------------------------------------------------------------------
def _dense_t(key, cin, cout, scale=0.1):
    kw, kb = jax.random.split(key)
    wT = jax.random.normal(kw, (cout, cin), jnp.float32) * scale
    b = jax.random.normal(kb, (cout,), jnp.float32) * scale
    return wT, b


def init_params(key, nclass=4, in_channel=3):
    ks = jax.random.split(key, 32)
    it = iter(ks)

    def enc_params():
        return {
            "e1": _dense_t(next(it), in_channel, 8),
            "e2": _dense_t(next(it), 8, 16),
            "e3": _dense_t(next(it), 16, 32),
        }

    def dec_params():
        return {
            "d2u": _dense_t(next(it), 32, 16), "d2s": _dense_t(next(it), 16, 16),
            "d1u": _dense_t(next(it), 16, 8), "d1s": _dense_t(next(it), 8, 8),
            "d0u": _dense_t(next(it), 8, 8), "d0s": _dense_t(next(it), in_channel, 8),
        }

    params = {
        "encoder": enc_params(),
        "encoder_dual": enc_params(),
        "decoder": dec_params(),
        "decoder_dual": dec_params(),
        "seg_head": _dense_t(next(it), 8, nclass),
        "recon_head": _dense_t(next(it), 8, 1),
    }

    # InteractionBranch parameters (exact shapes from the PyTorch module, stored transposed).
    hidden = 32
    wrT, br = _dense_t(next(it), 1, nclass)        # recon_adjust: Conv2d(1, nclass, 1)
    w1T = jax.random.normal(next(it), (hidden, nclass), jnp.float32) * 0.1  # Conv2d(nclass,32,1,bias=False)
    w2T, b2 = _dense_t(next(it), hidden, nclass)   # Conv2d(32, nclass, 1)
    # BatchNorm2d(32) in eval mode, folded to per-channel scale/shift.
    gamma = 1.0 + 0.1 * jax.random.normal(next(it), (hidden,), jnp.float32)
    beta = 0.1 * jax.random.normal(next(it), (hidden,), jnp.float32)
    run_mean = 0.1 * jax.random.normal(next(it), (hidden,), jnp.float32)
    run_var = 1.0 + 0.05 * jnp.abs(jax.random.normal(next(it), (hidden,), jnp.float32))
    eps = 1e-5
    bn_scale = gamma / jnp.sqrt(run_var + eps)
    bn_shift = beta - run_mean * bn_scale
    params["interaction"] = {
        "wrT": wrT,                                 # (nclass, 1)
        "brT": br.reshape(nclass, 1),
        "w1T": w1T,                                 # (hidden, nclass)
        "bn_scale": bn_scale.reshape(hidden, 1),
        "bn_shift": bn_shift.reshape(hidden, 1),
        "w2T": w2T,                                 # (nclass, hidden)
        "b2T": b2.reshape(nclass, 1),
    }
    return params


if __name__ == "__main__":
    nb = 1
    nclass = 4
    in_channel = 3
    H = W = 16

    key = jax.random.PRNGKey(0)
    kx, kp = jax.random.split(key)
    x = jax.random.normal(kx, (4 * nb, in_channel, H, W), jnp.float32)   # NCHW like PyTorch
    params = init_params(kp, nclass=nclass, in_channel=in_channel)

    fwd = jax.jit(lambda p, inp: efficient_unet_forward(p, inp, dual=True, D=True))
    outputs = fwd(params, x)
    outputs = jax.block_until_ready(outputs)

    assert outputs["masks"].shape == (3 * nb, nclass, H, W)
    assert outputs["a"].shape == (nb, 1, H, W)
    assert outputs["a_prime_mix"].shape == (nb, 1, H, W)
    assert outputs["joint_output"].shape == (nb, nclass, H, W)
    assert len(outputs["domain_a"]) == 4 and len(outputs["domain_at"]) == 4
    assert all(jnp.all(jnp.isfinite(outputs[k]))
               for k in ("masks", "a", "a_prime_mix", "joint_output"))

    print("KERNEL_OK")
</pallas_src>

<mosaic_0001>
module attributes {stable_mosaic.version = 11 : i64} {
  func.func @kernel(%arg0: i32, %arg1: memref<3x128xf32, #tpu.memory_space<vmem>>, %arg2: memref<8x3xf32, #tpu.memory_space<vmem>>, %arg3: memref<8x1xf32, #tpu.memory_space<vmem>>, %arg4: memref<8x128xf32, #tpu.memory_space<vmem>>) attributes {dimension_semantics = [#tpu.dimension_semantics<parallel>], iteration_bounds = array<i64: 2>, scalar_prefetch = 0 : i64, scratch_operands = 0 : i64, tpu.core_type = #tpu.core_type<tc>, window_params = [{transform_indices = @transform_0, window_bounds = array<i64: 3, 128>}, {pipeline_mode = #tpu.pipeline_mode<synchronous>, transform_indices = @transform_1, window_bounds = array<i64: 8, 3>}, {pipeline_mode = #tpu.pipeline_mode<synchronous>, transform_indices = @transform_2, window_bounds = array<i64: 8, 1>}, {transform_indices = @transform_3, window_bounds = array<i64: 8, 128>}]} {
    %c0 = arith.constant 0 : index
    %c0_0 = arith.constant 0 : index
    %0 = vector.load %arg2[%c0, %c0_0] : memref<8x3xf32, #tpu.memory_space<vmem>>, vector<8x3xf32>
    %c0_1 = arith.constant 0 : index
    %c0_2 = arith.constant 0 : index
    %1 = vector.load %arg1[%c0_1, %c0_2] : memref<3x128xf32, #tpu.memory_space<vmem>>, vector<3x128xf32>
    %cst = arith.constant dense<0.000000e+00> : vector<8x128xf32>
    %2 = tpu.matmul %0, %1, %cst {dimension_numbers = #tpu.dot_dimension_numbers<[1], [0], [0], [1], [0, 0, 1, 1], [], []>} : vector<8x3xf32>, vector<3x128xf32>, vector<8x128xf32> -> vector<8x128xf32>
    %c0_3 = arith.constant 0 : index
    %c0_4 = arith.constant 0 : index
    %3 = vector.load %arg3[%c0_3, %c0_4] : memref<8x1xf32, #tpu.memory_space<vmem>>, vector<8x1xf32>
    %4 = vector.broadcast %3 : vector<8x1xf32> to vector<8x128xf32>
    %5 = arith.addf %2, %4 : vector<8x128xf32>
    %cst_5 = arith.constant 0.000000e+00 : f32
    %6 = vector.broadcast %cst_5 : f32 to vector<8x128xf32>
    %7 = arith.maximumf %5, %6 : vector<8x128xf32>
    %c0_6 = arith.constant 0 : index
    %c0_7 = arith.constant 0 : index
    %8 = vector.load %arg4[%c0_6, %c0_7] : memref<8x128xf32, #tpu.memory_space<vmem>>, vector<8x128xf32>
    tpu.vector_store %arg4[%c0_6, %c0_7], %7 {strides = array<i32>} : memref<8x128xf32, #tpu.memory_space<vmem>>, vector<8x128xf32>,
    return
  }
  func.func @transform_0(%arg0: i32) -> (i32, i32) {
    %c0_i32 = arith.constant 0 : i32
    %c0_i32_0 = arith.constant 0 : i32
    return %c0_i32, %arg0 : i32, i32
  }
  func.func @transform_1(%arg0: i32) -> (i32, i32) {
    %c0_i32 = arith.constant 0 : i32
    %c0_i32_0 = arith.constant 0 : i32
    %c0_i32_1 = arith.constant 0 : i32
    return %c0_i32, %c0_i32_0 : i32, i32
  }
  func.func @transform_2(%arg0: i32) -> (i32, i32) {
    %c0_i32 = arith.constant 0 : i32
    %c0_i32_0 = arith.constant 0 : i32
    %c0_i32_1 = arith.constant 0 : i32
    return %c0_i32, %c0_i32_0 : i32, i32
  }
  func.func @transform_3(%arg0: i32) -> (i32, i32) {
    %c0_i32 = arith.constant 0 : i32
    %c0_i32_0 = arith.constant 0 : i32
    return %c0_i32, %arg0 : i32, i32
  }
}

module attributes {stable_mosaic.version = 11 : i64} {
  func.func @kernel(%arg0: i32, %arg1: memref<8x128xf32, #tpu.memory_space<vmem>>, %arg2: memref<16x8xf32, #tpu.memory_space<vmem>>, %arg3: memref<16x1xf32, #tpu.memory_space<vmem>>, %arg4: memref<16x128xf32, #tpu.memory_space<vmem>>) attributes {dimension_semantics = [#tpu.dimension_semantics<parallel>], iteration_bounds = array<i64: 1>, scalar_prefetch = 0 : i64, scratch_operands = 0 : i64, tpu.core_type = #tpu.core_type<tc>, window_params = [{transform_indices = @transform_0, window_bounds = array<i64: 8, 128>}, {pipeline_mode = #tpu.pipeline_mode<synchronous>, transform_indices = @transform_1, window_bounds = array<i64: 16, 8>}, {pipeline_mode = #tpu.pipeline_mode<synchronous>, transform_indices = @transform_2, window_bounds = array<i64: 16, 1>}, {transform_indices = @transform_3, window_bounds = array<i64: 16, 128>}]} {
    %c0 = arith.constant 0 : index
    %c0_0 = arith.constant 0 : index
    %0 = vector.load %arg2[%c0, %c0_0] : memref<16x8xf32, #tpu.memory_space<vmem>>, vector<16x8xf32>
    %c0_1 = arith.constant 0 : index
    %c0_2 = arith.constant 0 : index
    %1 = vector.load %arg1[%c0_1, %c0_2] : memref<8x128xf32, #tpu.memory_space<vmem>>, vector<8x128xf32>
    %cst = arith.constant dense<0.000000e+00> : vector<16x128xf32>
    %2 = tpu.matmul %0, %1, %cst {dimension_numbers = #tpu.dot_dimension_numbers<[1], [0], [0], [1], [0, 0, 1, 1], [], []>} : vector<16x8xf32>, vector<8x128xf32>, vector<16x128xf32> -> vector<16x128xf32>
    %c0_3 = arith.constant 0 : index
    %c0_4 = arith.constant 0 : index
    %3 = vector.load %arg3[%c0_3, %c0_4] : memref<16x1xf32, #tpu.memory_space<vmem>>, vector<16x1xf32>
    %4 = vector.broadcast %3 : vector<16x1xf32> to vector<16x128xf32>
    %5 = arith.addf %2, %4 : vector<16x128xf32>
    %cst_5 = arith.constant 0.000000e+00 : f32
    %6 = vector.broadcast %cst_5 : f32 to vector<16x128xf32>
    %7 = arith.maximumf %5, %6 : vector<16x128xf32>
    %c0_6 = arith.constant 0 : index
    %c0_7 = arith.constant 0 : index
    %8 = vector.load %arg4[%c0_6, %c0_7] : memref<16x128xf32, #tpu.memory_space<vmem>>, vector<16x128xf32>
    tpu.vector_store %arg4[%c0_6, %c0_7], %7 {strides = array<i32>} : memref<16x128xf32, #tpu.memory_space<vmem>>, vector<16x128xf32>,
    return
  }
  func.func @transform_0(%arg0: i32) -> (i32, i32) {
    %c0_i32 = arith.constant 0 : i32
    %c0_i32_0 = arith.constant 0 : i32
    return %c0_i32, %arg0 : i32, i32
  }
  func.func @transform_1(%arg0: i32) -> (i32, i32) {
    %c0_i32 = arith.constant 0 : i32
    %c0_i32_0 = arith.constant 0 : i32
    %c0_i32_1 = arith.constant 0 : i32
    return %c0_i32, %c0_i32_0 : i32, i32
  }
  func.func @transform_2(%arg0: i32) -> (i32, i32) {
    %c0_i32 = arith.constant 0 : i32
    %c0_i32_0 = arith.constant 0 : i32
    %c0_i32_1 = arith.constant 0 : i32
    return %c0_i32, %c0_i32_0 : i32, i32
  }
  func.func @transform_3(%arg0: i32) -> (i32, i32) {
    %c0_i32 = arith.constant 0 : i32
    %c0_i32_0 = arith.constant 0 : i32
    return %c0_i32, %arg0 : i32, i32
  }
}

module attributes {stable_mosaic.version = 11 : i64} {
  func.func @_smask_kernel(%arg0: i32, %arg1: memref<8x128xf32, #tpu.memory_space<vmem>>, %arg2: memref<8x128xf32, #tpu.memory_space<vmem>>, %arg3: memref<8x128xf32, #tpu.memory_space<vmem>>, %arg4: memref<8x128xf32, #tpu.memory_space<vmem>>, %arg5: memref<8x128xf32, #tpu.memory_space<vmem>>, %arg6: memref<8x128xf32, #tpu.memory_space<vmem>>, %arg7: memref<8x128xf32, #tpu.memory_space<vmem>>) attributes {dimension_semantics = [#tpu.dimension_semantics<parallel>], iteration_bounds = array<i64: 1>, scalar_prefetch = 0 : i64, scratch_operands = 0 : i64, tpu.core_type = #tpu.core_type<tc>, window_params = [{transform_indices = @transform_0, window_bounds = array<i64: 8, 128>}, {transform_indices = @transform_1, window_bounds = array<i64: 8, 128>}, {transform_indices = @transform_2, window_bounds = array<i64: 8, 128>}, {transform_indices = @transform_3, window_bounds = array<i64: 8, 128>}, {transform_indices = @transform_4, window_bounds = array<i64: 8, 128>}, {transform_indices = @transform_5, window_bounds = array<i64: 8, 128>}, {transform_indices = @transform_6, window_bounds = array<i64: 8, 128>}]} {
    %c0 = arith.constant 0 : index
    %c0_0 = arith.constant 0 : index
    %0 = vector.load %arg1[%c0, %c0_0] : memref<8x128xf32, #tpu.memory_space<vmem>>, vector<8x128xf32>
    %1 = arith.negf %0 : vector<8x128xf32>
    %2 = math.exp %1 : vector<8x128xf32>
    %cst = arith.constant 1.000000e+00 : f32
    %3 = vector.broadcast %cst : f32 to vector<8x128xf32>
    %4 = arith.addf %3, %2 : vector<8x128xf32>
    %5 = arith.divf %3, %4 : vector<8x128xf32>
    %c0_1 = arith.constant 0 : index
    %c0_2 = arith.constant 0 : index
    %6 = vector.load %arg2[%c0_1, %c0_2] : memref<8x128xf32, #tpu.memory_space<vmem>>, vector<8x128xf32>
    %7 = arith.negf %6 : vector<8x128xf32>
    %8 = math.exp %7 : vector<8x128xf32>
    %cst_3 = arith.constant 1.000000e+00 : f32
    %9 = vector.broadcast %cst_3 : f32 to vector<8x128xf32>
    %10 = arith.addf %9, %8 : vector<8x128xf32>
    %11 = arith.divf %9, %10 : vector<8x128xf32>
    %c0_4 = arith.constant 0 : index
    %c0_5 = arith.constant 0 : index
    %12 = vector.load %arg3[%c0_4, %c0_5] : memref<8x128xf32, #tpu.memory_space<vmem>>, vector<8x128xf32>
    %c0_6 = arith.constant 0 : index
    %c0_7 = arith.constant 0 : index
    %13 = vector.load %arg4[%c0_6, %c0_7] : memref<8x128xf32, #tpu.memory_space<vmem>>, vector<8x128xf32>
    %14 = arith.mulf %11, %13 : vector<8x128xf32>
    %cst_8 = arith.constant 1.000000e+00 : f32
    %15 = vector.broadcast %cst_8 : f32 to vector<8x128xf32>
    %16 = arith.subf %15, %11 : vector<8x128xf32>
    %17 = arith.mulf %16, %12 : vector<8x128xf32>
    %18 = arith.addf %14, %17 : vector<8x128xf32>
    %c0_9 = arith.constant 0 : index
    %c0_10 = arith.constant 0 : index
    %19 = vector.load %arg5[%c0_9, %c0_10] : memref<8x128xf32, #tpu.memory_space<vmem>>, vector<8x128xf32>
    tpu.vector_store %arg5[%c0_9, %c0_10], %18 {strides = array<i32>} : memref<8x128xf32, #tpu.memory_space<vmem>>, vector<8x128xf32>,
    %20 = arith.mulf %5, %12 : vector<8x128xf32>
    %c0_11 = arith.constant 0 : index
    %c0_12 = arith.constant 0 : index
    %21 = vector.load %arg6[%c0_11, %c0_12] : memref<8x128xf32, #tpu.memory_space<vmem>>, vector<8x128xf32>
    tpu.vector_store %arg6[%c0_11, %c0_12], %20 {strides = array<i32>} : memref<8x128xf32, #tpu.memory_space<vmem>>, vector<8x128xf32>,
    %22 = arith.mulf %11, %13 : vector<8x128xf32>
    %c0_13 = arith.constant 0 : index
    %c0_14 = arith.constant 0 : index
    %23 = vector.load %arg7[%c0_13, %c0_14] : memref<8x128xf32, #tpu.memory_space<vmem>>, vector<8x128xf32>
    tpu.vector_store %arg7[%c0_13, %c0_14], %22 {strides = array<i32>} : memref<8x128xf32, #tpu.memory_space<vmem>>, vector<8x128xf32>,
    return
  }
  func.func @transform_0(%arg0: i32) -> (i32, i32) {
    %c0_i32 = arith.constant 0 : i32
    %c0_i32_0 = arith.constant 0 : i32
    return %arg0, %c0_i32 : i32, i32
  }
  func.func @transform_1(%arg0: i32) -> (i32, i32) {
    %c0_i32 = arith.constant 0 : i32
    %c0_i32_0 = arith.constant 0 : i32
    return %arg0, %c0_i32 : i32, i32
  }
  func.func @transform_2(%arg0: i32) -> (i32, i32) {
    %c0_i32 = arith.constant 0 : i32
    %c0_i32_0 = arith.constant 0 : i32
    return %arg0, %c0_i32 : i32, i32
  }
  func.func @transform_3(%arg0: i32) -> (i32, i32) {
    %c0_i32 = arith.constant 0 : i32
    %c0_i32_0 = arith.constant 0 : i32
    return %arg0, %c0_i32 : i32, i32
  }
  func.func @transform_4(%arg0: i32) -> (i32, i32) {
    %c0_i32 = arith.constant 0 : i32
    %c0_i32_0 = arith.constant 0 : i32
    return %arg0, %c0_i32 : i32, i32
  }
  func.func @transform_5(%arg0: i32) -> (i32, i32) {
    %c0_i32 = arith.constant 0 : i32
    %c0_i32_0 = arith.constant 0 : i32
    return %arg0, %c0_i32 : i32, i32
  }
  func.func @transform_6(%arg0: i32) -> (i32, i32) {
    %c0_i32 = arith.constant 0 : i32
    %c0_i32_0 = arith.constant 0 : i32
    return %arg0, %c0_i32 : i32, i32
  }
}

module attributes {stable_mosaic.version = 11 : i64} {
  func.func @kernel(%arg0: i32, %arg1: memref<16x128xf32, #tpu.memory_space<vmem>>, %arg2: memref<32x16xf32, #tpu.memory_space<vmem>>, %arg3: memref<32x1xf32, #tpu.memory_space<vmem>>, %arg4: memref<32x128xf32, #tpu.memory_space<vmem>>) attributes {dimension_semantics = [#tpu.dimension_semantics<parallel>], iteration_bounds = array<i64: 1>, scalar_prefetch = 0 : i64, scratch_operands = 0 : i64, tpu.core_type = #tpu.core_type<tc>, window_params = [{transform_indices = @transform_0, window_bounds = array<i64: 16, 128>}, {pipeline_mode = #tpu.pipeline_mode<synchronous>, transform_indices = @transform_1, window_bounds = array<i64: 32, 16>}, {pipeline_mode = #tpu.pipeline_mode<synchronous>, transform_indices = @transform_2, window_bounds = array<i64: 32, 1>}, {transform_indices = @transform_3, window_bounds = array<i64: 32, 128>}]} {
    %c0 = arith.constant 0 : index
    %c0_0 = arith.constant 0 : index
    %0 = vector.load %arg2[%c0, %c0_0] : memref<32x16xf32, #tpu.memory_space<vmem>>, vector<32x16xf32>
    %c0_1 = arith.constant 0 : index
    %c0_2 = arith.constant 0 : index
    %1 = vector.load %arg1[%c0_1, %c0_2] : memref<16x128xf32, #tpu.memory_space<vmem>>, vector<16x128xf32>
    %cst = arith.constant dense<0.000000e+00> : vector<32x128xf32>
    %2 = tpu.matmul %0, %1, %cst {dimension_numbers = #tpu.dot_dimension_numbers<[1], [0], [0], [1], [0, 0, 1, 1], [], []>} : vector<32x16xf32>, vector<16x128xf32>, vector<32x128xf32> -> vector<32x128xf32>
    %c0_3 = arith.constant 0 : index
    %c0_4 = arith.constant 0 : index
    %3 = vector.load %arg3[%c0_3, %c0_4] : memref<32x1xf32, #tpu.memory_space<vmem>>, vector<32x1xf32>
    %4 = vector.broadcast %3 : vector<32x1xf32> to vector<32x128xf32>
    %5 = arith.addf %2, %4 : vector<32x128xf32>
    %cst_5 = arith.constant 0.000000e+00 : f32
    %6 = vector.broadcast %cst_5 : f32 to vector<32x128xf32>
    %7 = arith.maximumf %5, %6 : vector<32x128xf32>
    %c0_6 = arith.constant 0 : index
    %c0_7 = arith.constant 0 : index
    %8 = vector.load %arg4[%c0_6, %c0_7] : memref<32x128xf32, #tpu.memory_space<vmem>>, vector<32x128xf32>
    tpu.vector_store %arg4[%c0_6, %c0_7], %7 {strides = array<i32>} : memref<32x128xf32, #tpu.memory_space<vmem>>, vector<32x128xf32>,
    return
  }
  func.func @transform_0(%arg0: i32) -> (i32, i32) {
    %c0_i32 = arith.constant 0 : i32
    %c0_i32_0 = arith.constant 0 : i32
    return %c0_i32, %arg0 : i32, i32
  }
  func.func @transform_1(%arg0: i32) -> (i32, i32) {
    %c0_i32 = arith.constant 0 : i32
    %c0_i32_0 = arith.constant 0 : i32
    %c0_i32_1 = arith.constant 0 : i32
    return %c0_i32, %c0_i32_0 : i32, i32
  }
  func.func @transform_2(%arg0: i32) -> (i32, i32) {
    %c0_i32 = arith.constant 0 : i32
    %c0_i32_0 = arith.constant 0 : i32
    %c0_i32_1 = arith.constant 0 : i32
    return %c0_i32, %c0_i32_0 : i32, i32
  }
  func.func @transform_3(%arg0: i32) -> (i32, i32) {
    %c0_i32 = arith.constant 0 : i32
    %c0_i32_0 = arith.constant 0 : i32
    return %c0_i32, %arg0 : i32, i32
  }
}

module attributes {stable_mosaic.version = 11 : i64} {
  func.func @kernel(%arg0: i32, %arg1: memref<32x128xf32, #tpu.memory_space<vmem>>, %arg2: memref<16x32xf32, #tpu.memory_space<vmem>>, %arg3: memref<16x128xf32, #tpu.memory_space<vmem>>, %arg4: memref<16x16xf32, #tpu.memory_space<vmem>>, %arg5: memref<16x1xf32, #tpu.memory_space<vmem>>, %arg6: memref<16x128xf32, #tpu.memory_space<vmem>>) attributes {dimension_semantics = [#tpu.dimension_semantics<parallel>], iteration_bounds = array<i64: 1>, scalar_prefetch = 0 : i64, scratch_operands = 0 : i64, tpu.core_type = #tpu.core_type<tc>, window_params = [{transform_indices = @transform_0, window_bounds = array<i64: 32, 128>}, {pipeline_mode = #tpu.pipeline_mode<synchronous>, transform_indices = @transform_1, window_bounds = array<i64: 16, 32>}, {transform_indices = @transform_2, window_bounds = array<i64: 16, 128>}, {pipeline_mode = #tpu.pipeline_mode<synchronous>, transform_indices = @transform_3, window_bounds = array<i64: 16, 16>}, {pipeline_mode = #tpu.pipeline_mode<synchronous>, transform_indices = @transform_4, window_bounds = array<i64: 16, 1>}, {transform_indices = @transform_5, window_bounds = array<i64: 16, 128>}]} {
    %c0 = arith.constant 0 : index
    %c0_0 = arith.constant 0 : index
    %0 = vector.load %arg2[%c0, %c0_0] : memref<16x32xf32, #tpu.memory_space<vmem>>, vector<16x32xf32>
    %c0_1 = arith.constant 0 : index
    %c0_2 = arith.constant 0 : index
    %1 = vector.load %arg1[%c0_1, %c0_2] : memref<32x128xf32, #tpu.memory_space<vmem>>, vector<32x128xf32>
    %cst = arith.constant dense<0.000000e+00> : vector<16x128xf32>
    %2 = tpu.matmul %0, %1, %cst {dimension_numbers = #tpu.dot_dimension_numbers<[1], [0], [0], [1], [0, 0, 1, 1], [], []>} : vector<16x32xf32>, vector<32x128xf32>, vector<16x128xf32> -> vector<16x128xf32>
    %c0_3 = arith.constant 0 : index
    %c0_4 = arith.constant 0 : index
    %3 = vector.load %arg4[%c0_3, %c0_4] : memref<16x16xf32, #tpu.memory_space<vmem>>, vector<16x16xf32>
    %c0_5 = arith.constant 0 : index
    %c0_6 = arith.constant 0 : index
    %4 = vector.load %arg3[%c0_5, %c0_6] : memref<16x128xf32, #tpu.memory_space<vmem>>, vector<16x128xf32>
    %cst_7 = arith.constant dense<0.000000e+00> : vector<16x128xf32>
    %5 = tpu.matmul %3, %4, %cst_7 {dimension_numbers = #tpu.dot_dimension_numbers<[1], [0], [0], [1], [0, 0, 1, 1], [], []>} : vector<16x16xf32>, vector<16x128xf32>, vector<16x128xf32> -> vector<16x128xf32>
    %6 = arith.addf %2, %5 : vector<16x128xf32>
    %c0_8 = arith.constant 0 : index
    %c0_9 = arith.constant 0 : index
    %7 = vector.load %arg5[%c0_8, %c0_9] : memref<16x1xf32, #tpu.memory_space<vmem>>, vector<16x1xf32>
    %8 = vector.broadcast %7 : vector<16x1xf32> to vector<16x128xf32>
    %9 = arith.addf %6, %8 : vector<16x128xf32>
    %cst_10 = arith.constant 0.000000e+00 : f32
    %10 = vector.broadcast %cst_10 : f32 to vector<16x128xf32>
    %11 = arith.maximumf %9, %10 : vector<16x128xf32>
    %c0_11 = arith.constant 0 : index
    %c0_12 = arith.constant 0 : index
    %12 = vector.load %arg6[%c0_11, %c0_12] : memref<16x128xf32, #tpu.memory_space<vmem>>, vector<16x128xf32>
    tpu.vector_store %arg6[%c0_11, %c0_12], %11 {strides = array<i32>} : memref<16x128xf32, #tpu.memory_space<vmem>>, vector<16x128xf32>,
    return
  }
  func.func @transform_0(%arg0: i32) -> (i32, i32) {
    %c0_i32 = arith.constant 0 : i32
    %c0_i32_0 = arith.constant 0 : i32
    return %c0_i32, %arg0 : i32, i32
  }
  func.func @transform_1(%arg0: i32) -> (i32, i32) {
    %c0_i32 = arith.constant 0 : i32
    %c0_i32_0 = arith.constant 0 : i32
    %c0_i32_1 = arith.constant 0 : i32
    return %c0_i32, %c0_i32_0 : i32, i32
  }
  func.func @transform_2(%arg0: i32) -> (i32, i32) {
    %c0_i32 = arith.constant 0 : i32
    %c0_i32_0 = arith.constant 0 : i32
    return %c0_i32, %arg0 : i32, i32
  }
  func.func @transform_3(%arg0: i32) -> (i32, i32) {
    %c0_i32 = arith.constant 0 : i32
    %c0_i32_0 = arith.constant 0 : i32
    %c0_i32_1 = arith.constant 0 : i32
    return %c0_i32, %c0_i32_0 : i32, i32
  }
  func.func @transform_4(%arg0: i32) -> (i32, i32) {
    %c0_i32 = arith.constant 0 : i32
    %c0_i32_0 = arith.constant 0 : i32
    %c0_i32_1 = arith.constant 0 : i32
    return %c0_i32, %c0_i32_0 : i32, i32
  }
  func.func @transform_5(%arg0: i32) -> (i32, i32) {
    %c0_i32 = arith.constant 0 : i32
    %c0_i32_0 = arith.constant 0 : i32
    return %c0_i32, %arg0 : i32, i32
  }
}

module attributes {stable_mosaic.version = 11 : i64} {
  func.func @kernel(%arg0: i32, %arg1: memref<16x128xf32, #tpu.memory_space<vmem>>, %arg2: memref<8x16xf32, #tpu.memory_space<vmem>>, %arg3: memref<8x128xf32, #tpu.memory_space<vmem>>, %arg4: memref<8x8xf32, #tpu.memory_space<vmem>>, %arg5: memref<8x1xf32, #tpu.memory_space<vmem>>, %arg6: memref<8x128xf32, #tpu.memory_space<vmem>>) attributes {dimension_semantics = [#tpu.dimension_semantics<parallel>], iteration_bounds = array<i64: 1>, scalar_prefetch = 0 : i64, scratch_operands = 0 : i64, tpu.core_type = #tpu.core_type<tc>, window_params = [{transform_indices = @transform_0, window_bounds = array<i64: 16, 128>}, {pipeline_mode = #tpu.pipeline_mode<synchronous>, transform_indices = @transform_1, window_bounds = array<i64: 8, 16>}, {transform_indices = @transform_2, window_bounds = array<i64: 8, 128>}, {pipeline_mode = #tpu.pipeline_mode<synchronous>, transform_indices = @transform_3, window_bounds = array<i64: 8, 8>}, {pipeline_mode = #tpu.pipeline_mode<synchronous>, transform_indices = @transform_4, window_bounds = array<i64: 8, 1>}, {transform_indices = @transform_5, window_bounds = array<i64: 8, 128>}]} {
    %c0 = arith.constant 0 : index
    %c0_0 = arith.constant 0 : index
    %0 = vector.load %arg2[%c0, %c0_0] : memref<8x16xf32, #tpu.memory_space<vmem>>, vector<8x16xf32>
    %c0_1 = arith.constant 0 : index
    %c0_2 = arith.constant 0 : index
    %1 = vector.load %arg1[%c0_1, %c0_2] : memref<16x128xf32, #tpu.memory_space<vmem>>, vector<16x128xf32>
    %cst = arith.constant dense<0.000000e+00> : vector<8x128xf32>
    %2 = tpu.matmul %0, %1, %cst {dimension_numbers = #tpu.dot_dimension_numbers<[1], [0], [0], [1], [0, 0, 1, 1], [], []>} : vector<8x16xf32>, vector<16x128xf32>, vector<8x128xf32> -> vector<8x128xf32>
    %c0_3 = arith.constant 0 : index
    %c0_4 = arith.constant 0 : index
    %3 = vector.load %arg4[%c0_3, %c0_4] : memref<8x8xf32, #tpu.memory_space<vmem>>, vector<8x8xf32>
    %c0_5 = arith.constant 0 : index
    %c0_6 = arith.constant 0 : index
    %4 = vector.load %arg3[%c0_5, %c0_6] : memref<8x128xf32, #tpu.memory_space<vmem>>, vector<8x128xf32>
    %cst_7 = arith.constant dense<0.000000e+00> : vector<8x128xf32>
    %5 = tpu.matmul %3, %4, %cst_7 {dimension_numbers = #tpu.dot_dimension_numbers<[1], [0], [0], [1], [0, 0, 1, 1], [], []>} : vector<8x8xf32>, vector<8x128xf32>, vector<8x128xf32> -> vector<8x128xf32>
    %6 = arith.addf %2, %5 : vector<8x128xf32>
    %c0_8 = arith.constant 0 : index
    %c0_9 = arith.constant 0 : index
    %7 = vector.load %arg5[%c0_8, %c0_9] : memref<8x1xf32, #tpu.memory_space<vmem>>, vector<8x1xf32>
    %8 = vector.broadcast %7 : vector<8x1xf32> to vector<8x128xf32>
    %9 = arith.addf %6, %8 : vector<8x128xf32>
    %cst_10 = arith.constant 0.000000e+00 : f32
    %10 = vector.broadcast %cst_10 : f32 to vector<8x128xf32>
    %11 = arith.maximumf %9, %10 : vector<8x128xf32>
    %c0_11 = arith.constant 0 : index
    %c0_12 = arith.constant 0 : index
    %12 = vector.load %arg6[%c0_11, %c0_12] : memref<8x128xf32, #tpu.memory_space<vmem>>, vector<8x128xf32>
    tpu.vector_store %arg6[%c0_11, %c0_12], %11 {strides = array<i32>} : memref<8x128xf32, #tpu.memory_space<vmem>>, vector<8x128xf32>,
    return
  }
  func.func @transform_0(%arg0: i32) -> (i32, i32) {
    %c0_i32 = arith.constant 0 : i32
    %c0_i32_0 = arith.constant 0 : i32
    return %c0_i32, %arg0 : i32, i32
  }
  func.func @transform_1(%arg0: i32) -> (i32, i32) {
    %c0_i32 = arith.constant 0 : i32
    %c0_i32_0 = arith.constant 0 : i32
    %c0_i32_1 = arith.constant 0 : i32
    return %c0_i32, %c0_i32_0 : i32, i32
  }
  func.func @transform_2(%arg0: i32) -> (i32, i32) {
    %c0_i32 = arith.constant 0 : i32
    %c0_i32_0 = arith.constant 0 : i32
    return %c0_i32, %arg0 : i32, i32
  }
  func.func @transform_3(%arg0: i32) -> (i32, i32) {
    %c0_i32 = arith.constant 0 : i32
    %c0_i32_0 = arith.constant 0 : i32
    %c0_i32_1 = arith.constant 0 : i32
    return %c0_i32, %c0_i32_0 : i32, i32
  }
  func.func @transform_4(%arg0: i32) -> (i32, i32) {
    %c0_i32 = arith.constant 0 : i32
    %c0_i32_0 = arith.constant 0 : i32
    %c0_i32_1 = arith.constant 0 : i32
    return %c0_i32, %c0_i32_0 : i32, i32
  }
  func.func @transform_5(%arg0: i32) -> (i32, i32) {
    %c0_i32 = arith.constant 0 : i32
    %c0_i32_0 = arith.constant 0 : i32
    return %c0_i32, %arg0 : i32, i32
  }
}

module attributes {stable_mosaic.version = 11 : i64} {
  func.func @kernel(%arg0: i32, %arg1: memref<8x256xf32, #tpu.memory_space<vmem>>, %arg2: memref<8x8xf32, #tpu.memory_space<vmem>>, %arg3: memref<3x256xf32, #tpu.memory_space<vmem>>, %arg4: memref<8x3xf32, #tpu.memory_space<vmem>>, %arg5: memref<8x1xf32, #tpu.memory_space<vmem>>, %arg6: memref<8x256xf32, #tpu.memory_space<vmem>>) attributes {dimension_semantics = [#tpu.dimension_semantics<parallel>], iteration_bounds = array<i64: 2>, scalar_prefetch = 0 : i64, scratch_operands = 0 : i64, tpu.core_type = #tpu.core_type<tc>, window_params = [{transform_indices = @transform_0, window_bounds = array<i64: 8, 256>}, {pipeline_mode = #tpu.pipeline_mode<synchronous>, transform_indices = @transform_1, window_bounds = array<i64: 8, 8>}, {transform_indices = @transform_2, window_bounds = array<i64: 3, 256>}, {pipeline_mode = #tpu.pipeline_mode<synchronous>, transform_indices = @transform_3, window_bounds = array<i64: 8, 3>}, {pipeline_mode = #tpu.pipeline_mode<synchronous>, transform_indices = @transform_4, window_bounds = array<i64: 8, 1>}, {transform_indices = @transform_5, window_bounds = array<i64: 8, 256>}]} {
    %c0 = arith.constant 0 : index
    %c0_0 = arith.constant 0 : index
    %0 = vector.load %arg2[%c0, %c0_0] : memref<8x8xf32, #tpu.memory_space<vmem>>, vector<8x8xf32>
    %c0_1 = arith.constant 0 : index
    %c0_2 = arith.constant 0 : index
    %1 = vector.load %arg1[%c0_1, %c0_2] : memref<8x256xf32, #tpu.memory_space<vmem>>, vector<8x256xf32>
    %cst = arith.constant dense<0.000000e+00> : vector<8x256xf32>
    %2 = tpu.matmul %0, %1, %cst {dimension_numbers = #tpu.dot_dimension_numbers<[1], [0], [0], [1], [0, 0, 1, 1], [], []>} : vector<8x8xf32>, vector<8x256xf32>, vector<8x256xf32> -> vector<8x256xf32>
    %c0_3 = arith.constant 0 : index
    %c0_4 = arith.constant 0 : index
    %3 = vector.load %arg4[%c0_3, %c0_4] : memref<8x3xf32, #tpu.memory_space<vmem>>, vector<8x3xf32>
    %c0_5 = arith.constant 0 : index
    %c0_6 = arith.constant 0 : index
    %4 = vector.load %arg3[%c0_5, %c0_6] : memref<3x256xf32, #tpu.memory_space<vmem>>, vector<3x256xf32>
    %cst_7 = arith.constant dense<0.000000e+00> : vector<8x256xf32>
    %5 = tpu.matmul %3, %4, %cst_7 {dimension_numbers = #tpu.dot_dimension_numbers<[1], [0], [0], [1], [0, 0, 1, 1], [], []>} : vector<8x3xf32>, vector<3x256xf32>, vector<8x256xf32> -> vector<8x256xf32>
    %6 = arith.addf %2, %5 : vector<8x256xf32>
    %c0_8 = arith.constant 0 : index
    %c0_9 = arith.constant 0 : index
    %7 = vector.load %arg5[%c0_8, %c0_9] : memref<8x1xf32, #tpu.memory_space<vmem>>, vector<8x1xf32>
    %8 = vector.broadcast %7 : vector<8x1xf32> to vector<8x256xf32>
    %9 = arith.addf %6, %8 : vector<8x256xf32>
    %cst_10 = arith.constant 0.000000e+00 : f32
    %10 = vector.broadcast %cst_10 : f32 to vector<8x256xf32>
    %11 = arith.maximumf %9, %10 : vector<8x256xf32>
    %c0_11 = arith.constant 0 : index
    %c0_12 = arith.constant 0 : index
    %12 = vector.load %arg6[%c0_11, %c0_12] : memref<8x256xf32, #tpu.memory_space<vmem>>, vector<8x256xf32>
    tpu.vector_store %arg6[%c0_11, %c0_12], %11 {strides = array<i32>} : memref<8x256xf32, #tpu.memory_space<vmem>>, vector<8x256xf32>,
    return
  }
  func.func @transform_0(%arg0: i32) -> (i32, i32) {
    %c0_i32 = arith.constant 0 : i32
    %c0_i32_0 = arith.constant 0 : i32
    return %c0_i32, %arg0 : i32, i32
  }
  func.func @transform_1(%arg0: i32) -> (i32, i32) {
    %c0_i32 = arith.constant 0 : i32
    %c0_i32_0 = arith.constant 0 : i32
    %c0_i32_1 = arith.constant 0 : i32
    return %c0_i32, %c0_i32_0 : i32, i32
  }
  func.func @transform_2(%arg0: i32) -> (i32, i32) {
    %c0_i32 = arith.constant 0 : i32
    %c0_i32_0 = arith.constant 0 : i32
    return %c0_i32, %arg0 : i32, i32
  }
  func.func @transform_3(%arg0: i32) -> (i32, i32) {
    %c0_i32 = arith.constant 0 : i32
    %c0_i32_0 = arith.constant 0 : i32
    %c0_i32_1 = arith.constant 0 : i32
    return %c0_i32, %c0_i32_0 : i32, i32
  }
  func.func @transform_4(%arg0: i32) -> (i32, i32) {
    %c0_i32 = arith.constant 0 : i32
    %c0_i32_0 = arith.constant 0 : i32
    %c0_i32_1 = arith.constant 0 : i32
    return %c0_i32, %c0_i32_0 : i32, i32
  }
  func.func @transform_5(%arg0: i32) -> (i32, i32) {
    %c0_i32 = arith.constant 0 : i32
    %c0_i32_0 = arith.constant 0 : i32
    return %c0_i32, %arg0 : i32, i32
  }
}

module attributes {stable_mosaic.version = 11 : i64} {
  func.func @kernel(%arg0: i32, %arg1: memref<8x256xf32, #tpu.memory_space<vmem>>, %arg2: memref<1x8xf32, #tpu.memory_space<vmem>>, %arg3: memref<1x1xf32, #tpu.memory_space<vmem>>, %arg4: memref<1x256xf32, #tpu.memory_space<vmem>>) attributes {dimension_semantics = [#tpu.dimension_semantics<parallel>], iteration_bounds = array<i64: 2>, scalar_prefetch = 0 : i64, scratch_operands = 0 : i64, tpu.core_type = #tpu.core_type<tc>, window_params = [{transform_indices = @transform_0, window_bounds = array<i64: 8, 256>}, {pipeline_mode = #tpu.pipeline_mode<synchronous>, transform_indices = @transform_1, window_bounds = array<i64: 1, 8>}, {pipeline_mode = #tpu.pipeline_mode<synchronous>, transform_indices = @transform_2, window_bounds = array<i64: 1, 1>}, {transform_indices = @transform_3, window_bounds = array<i64: 1, 256>}]} {
    %c0 = arith.constant 0 : index
    %c0_0 = arith.constant 0 : index
    %0 = vector.load %arg2[%c0, %c0_0] : memref<1x8xf32, #tpu.memory_space<vmem>>, vector<1x8xf32>
    %c0_1 = arith.constant 0 : index
    %c0_2 = arith.constant 0 : index
    %1 = vector.load %arg1[%c0_1, %c0_2] : memref<8x256xf32, #tpu.memory_space<vmem>>, vector<8x256xf32>
    %cst = arith.constant dense<0.000000e+00> : vector<1x256xf32>
    %2 = tpu.matmul %0, %1, %cst {dimension_numbers = #tpu.dot_dimension_numbers<[1], [0], [0], [1], [0, 0, 1, 1], [], []>} : vector<1x8xf32>, vector<8x256xf32>, vector<1x256xf32> -> vector<1x256xf32>
    %c0_3 = arith.constant 0 : index
    %c0_4 = arith.constant 0 : index
    %3 = vector.load %arg3[%c0_3, %c0_4] : memref<1x1xf32, #tpu.memory_space<vmem>>, vector<1x1xf32>
    %4 = vector.broadcast %3 : vector<1x1xf32> to vector<1x256xf32>
    %5 = arith.addf %2, %4 : vector<1x256xf32>
    %c0_5 = arith.constant 0 : index
    %c0_6 = arith.constant 0 : index
    %6 = vector.load %arg4[%c0_5, %c0_6] : memref<1x256xf32, #tpu.memory_space<vmem>>, vector<1x256xf32>
    tpu.vector_store %arg4[%c0_5, %c0_6], %5 {strides = array<i32>} : memref<1x256xf32, #tpu.memory_space<vmem>>, vector<1x256xf32>,
    return
  }
  func.func @transform_0(%arg0: i32) -> (i32, i32) {
    %c0_i32 = arith.constant 0 : i32
    %c0_i32_0 = arith.constant 0 : i32
    return %c0_i32, %arg0 : i32, i32
  }
  func.func @transform_1(%arg0: i32) -> (i32, i32) {
    %c0_i32 = arith.constant 0 : i32
    %c0_i32_0 = arith.constant 0 : i32
    %c0_i32_1 = arith.constant 0 : i32
    return %c0_i32, %c0_i32_0 : i32, i32
  }
  func.func @transform_2(%arg0: i32) -> (i32, i32) {
    %c0_i32 = arith.constant 0 : i32
    %c0_i32_0 = arith.constant 0 : i32
    %c0_i32_1 = arith.constant 0 : i32
    return %c0_i32, %c0_i32_0 : i32, i32
  }
  func.func @transform_3(%arg0: i32) -> (i32, i32) {
    %c0_i32 = arith.constant 0 : i32
    %c0_i32_0 = arith.constant 0 : i32
    return %c0_i32, %arg0 : i32, i32
  }
}

module attributes {stable_mosaic.version = 11 : i64} {
  func.func @kernel(%arg0: i32, %arg1: memref<16x128xf32, #tpu.memory_space<vmem>>, %arg2: memref<8x16xf32, #tpu.memory_space<vmem>>, %arg3: memref<8x128xf32, #tpu.memory_space<vmem>>, %arg4: memref<8x8xf32, #tpu.memory_space<vmem>>, %arg5: memref<8x1xf32, #tpu.memory_space<vmem>>, %arg6: memref<8x128xf32, #tpu.memory_space<vmem>>) attributes {dimension_semantics = [#tpu.dimension_semantics<parallel>], iteration_bounds = array<i64: 2>, scalar_prefetch = 0 : i64, scratch_operands = 0 : i64, tpu.core_type = #tpu.core_type<tc>, window_params = [{transform_indices = @transform_0, window_bounds = array<i64: 16, 128>}, {pipeline_mode = #tpu.pipeline_mode<synchronous>, transform_indices = @transform_1, window_bounds = array<i64: 8, 16>}, {transform_indices = @transform_2, window_bounds = array<i64: 8, 128>}, {pipeline_mode = #tpu.pipeline_mode<synchronous>, transform_indices = @transform_3, window_bounds = array<i64: 8, 8>}, {pipeline_mode = #tpu.pipeline_mode<synchronous>, transform_indices = @transform_4, window_bounds = array<i64: 8, 1>}, {transform_indices = @transform_5, window_bounds = array<i64: 8, 128>}]} {
    %c0 = arith.constant 0 : index
    %c0_0 = arith.constant 0 : index
    %0 = vector.load %arg2[%c0, %c0_0] : memref<8x16xf32, #tpu.memory_space<vmem>>, vector<8x16xf32>
    %c0_1 = arith.constant 0 : index
    %c0_2 = arith.constant 0 : index
    %1 = vector.load %arg1[%c0_1, %c0_2] : memref<16x128xf32, #tpu.memory_space<vmem>>, vector<16x128xf32>
    %cst = arith.constant dense<0.000000e+00> : vector<8x128xf32>
    %2 = tpu.matmul %0, %1, %cst {dimension_numbers = #tpu.dot_dimension_numbers<[1], [0], [0], [1], [0, 0, 1, 1], [], []>} : vector<8x16xf32>, vector<16x128xf32>, vector<8x128xf32> -> vector<8x128xf32>
    %c0_3 = arith.constant 0 : index
    %c0_4 = arith.constant 0 : index
    %3 = vector.load %arg4[%c0_3, %c0_4] : memref<8x8xf32, #tpu.memory_space<vmem>>, vector<8x8xf32>
    %c0_5 = arith.constant 0 : index
    %c0_6 = arith.constant 0 : index
    %4 = vector.load %arg3[%c0_5, %c0_6] : memref<8x128xf32, #tpu.memory_space<vmem>>, vector<8x128xf32>
    %cst_7 = arith.constant dense<0.000000e+00> : vector<8x128xf32>
    %5 = tpu.matmul %3, %4, %cst_7 {dimension_numbers = #tpu.dot_dimension_numbers<[1], [0], [0], [1], [0, 0, 1, 1], [], []>} : vector<8x8xf32>, vector<8x128xf32>, vector<8x128xf32> -> vector<8x128xf32>
    %6 = arith.addf %2, %5 : vector<8x128xf32>
    %c0_8 = arith.constant 0 : index
    %c0_9 = arith.constant 0 : index
    %7 = vector.load %arg5[%c0_8, %c0_9] : memref<8x1xf32, #tpu.memory_space<vmem>>, vector<8x1xf32>
    %8 = vector.broadcast %7 : vector<8x1xf32> to vector<8x128xf32>
    %9 = arith.addf %6, %8 : vector<8x128xf32>
    %cst_10 = arith.constant 0.000000e+00 : f32
    %10 = vector.broadcast %cst_10 : f32 to vector<8x128xf32>
    %11 = arith.maximumf %9, %10 : vector<8x128xf32>
    %c0_11 = arith.constant 0 : index
    %c0_12 = arith.constant 0 : index
    %12 = vector.load %arg6[%c0_11, %c0_12] : memref<8x128xf32, #tpu.memory_space<vmem>>, vector<8x128xf32>
    tpu.vector_store %arg6[%c0_11, %c0_12], %11 {strides = array<i32>} : memref<8x128xf32, #tpu.memory_space<vmem>>, vector<8x128xf32>,
    return
  }
  func.func @transform_0(%arg0: i32) -> (i32, i32) {
    %c0_i32 = arith.constant 0 : i32
    %c0_i32_0 = arith.constant 0 : i32
    return %c0_i32, %arg0 : i32, i32
  }
  func.func @transform_1(%arg0: i32) -> (i32, i32) {
    %c0_i32 = arith.constant 0 : i32
    %c0_i32_0 = arith.constant 0 : i32
    %c0_i32_1 = arith.constant 0 : i32
    return %c0_i32, %c0_i32_0 : i32, i32
  }
  func.func @transform_2(%arg0: i32) -> (i32, i32) {
    %c0_i32 = arith.constant 0 : i32
    %c0_i32_0 = arith.constant 0 : i32
    return %c0_i32, %arg0 : i32, i32
  }
  func.func @transform_3(%arg0: i32) -> (i32, i32) {
    %c0_i32 = arith.constant 0 : i32
    %c0_i32_0 = arith.constant 0 : i32
    %c0_i32_1 = arith.constant 0 : i32
    return %c0_i32, %c0_i32_0 : i32, i32
  }
  func.func @transform_4(%arg0: i32) -> (i32, i32) {
    %c0_i32 = arith.constant 0 : i32
    %c0_i32_0 = arith.constant 0 : i32
    %c0_i32_1 = arith.constant 0 : i32
    return %c0_i32, %c0_i32_0 : i32, i32
  }
  func.func @transform_5(%arg0: i32) -> (i32, i32) {
    %c0_i32 = arith.constant 0 : i32
    %c0_i32_0 = arith.constant 0 : i32
    return %c0_i32, %arg0 : i32, i32
  }
}

module attributes {stable_mosaic.version = 11 : i64} {
  func.func @kernel(%arg0: i32, %arg1: memref<8x256xf32, #tpu.memory_space<vmem>>, %arg2: memref<8x8xf32, #tpu.memory_space<vmem>>, %arg3: memref<3x256xf32, #tpu.memory_space<vmem>>, %arg4: memref<8x3xf32, #tpu.memory_space<vmem>>, %arg5: memref<8x1xf32, #tpu.memory_space<vmem>>, %arg6: memref<8x256xf32, #tpu.memory_space<vmem>>) attributes {dimension_semantics = [#tpu.dimension_semantics<parallel>], iteration_bounds = array<i64: 3>, scalar_prefetch = 0 : i64, scratch_operands = 0 : i64, tpu.core_type = #tpu.core_type<tc>, window_params = [{transform_indices = @transform_0, window_bounds = array<i64: 8, 256>}, {pipeline_mode = #tpu.pipeline_mode<synchronous>, transform_indices = @transform_1, window_bounds = array<i64: 8, 8>}, {transform_indices = @transform_2, window_bounds = array<i64: 3, 256>}, {pipeline_mode = #tpu.pipeline_mode<synchronous>, transform_indices = @transform_3, window_bounds = array<i64: 8, 3>}, {pipeline_mode = #tpu.pipeline_mode<synchronous>, transform_indices = @transform_4, window_bounds = array<i64: 8, 1>}, {transform_indices = @transform_5, window_bounds = array<i64: 8, 256>}]} {
    %c0 = arith.constant 0 : index
    %c0_0 = arith.constant 0 : index
    %0 = vector.load %arg2[%c0, %c0_0] : memref<8x8xf32, #tpu.memory_space<vmem>>, vector<8x8xf32>
    %c0_1 = arith.constant 0 : index
    %c0_2 = arith.constant 0 : index
    %1 = vector.load %arg1[%c0_1, %c0_2] : memref<8x256xf32, #tpu.memory_space<vmem>>, vector<8x256xf32>
    %cst = arith.constant dense<0.000000e+00> : vector<8x256xf32>
    %2 = tpu.matmul %0, %1, %cst {dimension_numbers = #tpu.dot_dimension_numbers<[1], [0], [0], [1], [0, 0, 1, 1], [], []>} : vector<8x8xf32>, vector<8x256xf32>, vector<8x256xf32> -> vector<8x256xf32>
    %c0_3 = arith.constant 0 : index
    %c0_4 = arith.constant 0 : index
    %3 = vector.load %arg4[%c0_3, %c0_4] : memref<8x3xf32, #tpu.memory_space<vmem>>, vector<8x3xf32>
    %c0_5 = arith.constant 0 : index
    %c0_6 = arith.constant 0 : index
    %4 = vector.load %arg3[%c0_5, %c0_6] : memref<3x256xf32, #tpu.memory_space<vmem>>, vector<3x256xf32>
    %cst_7 = arith.constant dense<0.000000e+00> : vector<8x256xf32>
    %5 = tpu.matmul %3, %4, %cst_7 {dimension_numbers = #tpu.dot_dimension_numbers<[1], [0], [0], [1], [0, 0, 1, 1], [], []>} : vector<8x3xf32>, vector<3x256xf32>, vector<8x256xf32> -> vector<8x256xf32>
    %6 = arith.addf %2, %5 : vector<8x256xf32>
    %c0_8 = arith.constant 0 : index
    %c0_9 = arith.constant 0 : index
    %7 = vector.load %arg5[%c0_8, %c0_9] : memref<8x1xf32, #tpu.memory_space<vmem>>, vector<8x1xf32>
    %8 = vector.broadcast %7 : vector<8x1xf32> to vector<8x256xf32>
    %9 = arith.addf %6, %8 : vector<8x256xf32>
    %cst_10 = arith.constant 0.000000e+00 : f32
    %10 = vector.broadcast %cst_10 : f32 to vector<8x256xf32>
    %11 = arith.maximumf %9, %10 : vector<8x256xf32>
    %c0_11 = arith.constant 0 : index
    %c0_12 = arith.constant 0 : index
    %12 = vector.load %arg6[%c0_11, %c0_12] : memref<8x256xf32, #tpu.memory_space<vmem>>, vector<8x256xf32>
    tpu.vector_store %arg6[%c0_11, %c0_12], %11 {strides = array<i32>} : memref<8x256xf32, #tpu.memory_space<vmem>>, vector<8x256xf32>,
    return
  }
  func.func @transform_0(%arg0: i32) -> (i32, i32) {
    %c0_i32 = arith.constant 0 : i32
    %c0_i32_0 = arith.constant 0 : i32
    return %c0_i32, %arg0 : i32, i32
  }
  func.func @transform_1(%arg0: i32) -> (i32, i32) {
    %c0_i32 = arith.constant 0 : i32
    %c0_i32_0 = arith.constant 0 : i32
    %c0_i32_1 = arith.constant 0 : i32
    return %c0_i32, %c0_i32_0 : i32, i32
  }
  func.func @transform_2(%arg0: i32) -> (i32, i32) {
    %c0_i32 = arith.constant 0 : i32
    %c0_i32_0 = arith.constant 0 : i32
    return %c0_i32, %arg0 : i32, i32
  }
  func.func @transform_3(%arg0: i32) -> (i32, i32) {
    %c0_i32 = arith.constant 0 : i32
    %c0_i32_0 = arith.constant 0 : i32
    %c0_i32_1 = arith.constant 0 : i32
    return %c0_i32, %c0_i32_0 : i32, i32
  }
  func.func @transform_4(%arg0: i32) -> (i32, i32) {
    %c0_i32 = arith.constant 0 : i32
    %c0_i32_0 = arith.constant 0 : i32
    %c0_i32_1 = arith.constant 0 : i32
    return %c0_i32, %c0_i32_0 : i32, i32
  }
  func.func @transform_5(%arg0: i32) -> (i32, i32) {
    %c0_i32 = arith.constant 0 : i32
    %c0_i32_0 = arith.constant 0 : i32
    return %c0_i32, %arg0 : i32, i32
  }
}

module attributes {stable_mosaic.version = 11 : i64} {
  func.func @kernel(%arg0: i32, %arg1: memref<8x256xf32, #tpu.memory_space<vmem>>, %arg2: memref<4x8xf32, #tpu.memory_space<vmem>>, %arg3: memref<4x1xf32, #tpu.memory_space<vmem>>, %arg4: memref<4x256xf32, #tpu.memory_space<vmem>>) attributes {dimension_semantics = [#tpu.dimension_semantics<parallel>], iteration_bounds = array<i64: 3>, scalar_prefetch = 0 : i64, scratch_operands = 0 : i64, tpu.core_type = #tpu.core_type<tc>, window_params = [{transform_indices = @transform_0, window_bounds = array<i64: 8, 256>}, {pipeline_mode = #tpu.pipeline_mode<synchronous>, transform_indices = @transform_1, window_bounds = array<i64: 4, 8>}, {pipeline_mode = #tpu.pipeline_mode<synchronous>, transform_indices = @transform_2, window_bounds = array<i64: 4, 1>}, {transform_indices = @transform_3, window_bounds = array<i64: 4, 256>}]} {
    %c0 = arith.constant 0 : index
    %c0_0 = arith.constant 0 : index
    %0 = vector.load %arg2[%c0, %c0_0] : memref<4x8xf32, #tpu.memory_space<vmem>>, vector<4x8xf32>
    %c0_1 = arith.constant 0 : index
    %c0_2 = arith.constant 0 : index
    %1 = vector.load %arg1[%c0_1, %c0_2] : memref<8x256xf32, #tpu.memory_space<vmem>>, vector<8x256xf32>
    %cst = arith.constant dense<0.000000e+00> : vector<4x256xf32>
    %2 = tpu.matmul %0, %1, %cst {dimension_numbers = #tpu.dot_dimension_numbers<[1], [0], [0], [1], [0, 0, 1, 1], [], []>} : vector<4x8xf32>, vector<8x256xf32>, vector<4x256xf32> -> vector<4x256xf32>
    %c0_3 = arith.constant 0 : index
    %c0_4 = arith.constant 0 : index
    %3 = vector.load %arg3[%c0_3, %c0_4] : memref<4x1xf32, #tpu.memory_space<vmem>>, vector<4x1xf32>
    %4 = vector.broadcast %3 : vector<4x1xf32> to vector<4x256xf32>
    %5 = arith.addf %2, %4 : vector<4x256xf32>
    %c0_5 = arith.constant 0 : index
    %c0_6 = arith.constant 0 : index
    %6 = vector.load %arg4[%c0_5, %c0_6] : memref<4x256xf32, #tpu.memory_space<vmem>>, vector<4x256xf32>
    tpu.vector_store %arg4[%c0_5, %c0_6], %5 {strides = array<i32>} : memref<4x256xf32, #tpu.memory_space<vmem>>, vector<4x256xf32>,
    return
  }
  func.func @transform_0(%arg0: i32) -> (i32, i32) {
    %c0_i32 = arith.constant 0 : i32
    %c0_i32_0 = arith.constant 0 : i32
    return %c0_i32, %arg0 : i32, i32
  }
  func.func @transform_1(%arg0: i32) -> (i32, i32) {
    %c0_i32 = arith.constant 0 : i32
    %c0_i32_0 = arith.constant 0 : i32
    %c0_i32_1 = arith.constant 0 : i32
    return %c0_i32, %c0_i32_0 : i32, i32
  }
  func.func @transform_2(%arg0: i32) -> (i32, i32) {
    %c0_i32 = arith.constant 0 : i32
    %c0_i32_0 = arith.constant 0 : i32
    %c0_i32_1 = arith.constant 0 : i32
    return %c0_i32, %c0_i32_0 : i32, i32
  }
  func.func @transform_3(%arg0: i32) -> (i32, i32) {
    %c0_i32 = arith.constant 0 : i32
    %c0_i32_0 = arith.constant 0 : i32
    return %c0_i32, %arg0 : i32, i32
  }
}

module attributes {stable_mosaic.version = 11 : i64} {
  func.func @_interaction_kernel(%arg0: i32, %arg1: memref<4x128xf32, #tpu.memory_space<vmem>>, %arg2: memref<1x128xf32, #tpu.memory_space<vmem>>, %arg3: memref<4x1xf32, #tpu.memory_space<vmem>>, %arg4: memref<4x1xf32, #tpu.memory_space<vmem>>, %arg5: memref<32x4xf32, #tpu.memory_space<vmem>>, %arg6: memref<32x1xf32, #tpu.memory_space<vmem>>, %arg7: memref<32x1xf32, #tpu.memory_space<vmem>>, %arg8: memref<4x32xf32, #tpu.memory_space<vmem>>, %arg9: memref<4x1xf32, #tpu.memory_space<vmem>>, %arg10: memref<4x128xf32, #tpu.memory_space<vmem>>) attributes {dimension_semantics = [#tpu.dimension_semantics<parallel>], iteration_bounds = array<i64: 2>, scalar_prefetch = 0 : i64, scratch_operands = 0 : i64, tpu.core_type = #tpu.core_type<tc>, window_params = [{transform_indices = @transform_0, window_bounds = array<i64: 4, 128>}, {transform_indices = @transform_1, window_bounds = array<i64: 1, 128>}, {pipeline_mode = #tpu.pipeline_mode<synchronous>, transform_indices = @transform_2, window_bounds = array<i64: 4, 1>}, {pipeline_mode = #tpu.pipeline_mode<synchronous>, transform_indices = @transform_3, window_bounds = array<i64: 4, 1>}, {pipeline_mode = #tpu.pipeline_mode<synchronous>, transform_indices = @transform_4, window_bounds = array<i64: 32, 4>}, {pipeline_mode = #tpu.pipeline_mode<synchronous>, transform_indices = @transform_5, window_bounds = array<i64: 32, 1>}, {pipeline_mode = #tpu.pipeline_mode<synchronous>, transform_indices = @transform_6, window_bounds = array<i64: 32, 1>}, {pipeline_mode = #tpu.pipeline_mode<synchronous>, transform_indices = @transform_7, window_bounds = array<i64: 4, 32>}, {pipeline_mode = #tpu.pipeline_mode<synchronous>, transform_indices = @transform_8, window_bounds = array<i64: 4, 1>}, {transform_indices = @transform_9, window_bounds = array<i64: 4, 128>}]} {
    %c0 = arith.constant 0 : index
    %c0_0 = arith.constant 0 : index
    %0 = vector.load %arg1[%c0, %c0_0] : memref<4x128xf32, #tpu.memory_space<vmem>>, vector<4x128xf32>
    %c0_1 = arith.constant 0 : index
    %c0_2 = arith.constant 0 : index
    %1 = vector.load %arg3[%c0_1, %c0_2] : memref<4x1xf32, #tpu.memory_space<vmem>>, vector<4x1xf32>
    %c0_3 = arith.constant 0 : index
    %c0_4 = arith.constant 0 : index
    %2 = vector.load %arg2[%c0_3, %c0_4] : memref<1x128xf32, #tpu.memory_space<vmem>>, vector<1x128xf32>
    %3 = vector.broadcast %1 : vector<4x1xf32> to vector<4x128xf32>
    %4 = vector.broadcast %2 : vector<1x128xf32> to vector<4x128xf32>
    %5 = arith.mulf %3, %4 : vector<4x128xf32>
    %6 = arith.addf %0, %5 : vector<4x128xf32>
    %c0_5 = arith.constant 0 : index
    %c0_6 = arith.constant 0 : index
    %7 = vector.load %arg4[%c0_5, %c0_6] : memref<4x1xf32, #tpu.memory_space<vmem>>, vector<4x1xf32>
    %8 = vector.broadcast %7 : vector<4x1xf32> to vector<4x128xf32>
    %9 = arith.addf %6, %8 : vector<4x128xf32>
    %c0_7 = arith.constant 0 : index
    %c0_8 = arith.constant 0 : index
    %10 = vector.load %arg5[%c0_7, %c0_8] : memref<32x4xf32, #tpu.memory_space<vmem>>, vector<32x4xf32>
    %cst = arith.constant dense<0.000000e+00> : vector<32x128xf32>
    %11 = tpu.matmul %10, %9, %cst {dimension_numbers = #tpu.dot_dimension_numbers<[1], [0], [0], [1], [0, 0, 1, 1], [], []>} : vector<32x4xf32>, vector<4x128xf32>, vector<32x128xf32> -> vector<32x128xf32>
    %c0_9 = arith.constant 0 : index
    %c0_10 = arith.constant 0 : index
    %12 = vector.load %arg6[%c0_9, %c0_10] : memref<32x1xf32, #tpu.memory_space<vmem>>, vector<32x1xf32>
    %13 = vector.broadcast %12 : vector<32x1xf32> to vector<32x128xf32>
    %14 = arith.mulf %11, %13 : vector<32x128xf32>
    %c0_11 = arith.constant 0 : index
    %c0_12 = arith.constant 0 : index
    %15 = vector.load %arg7[%c0_11, %c0_12] : memref<32x1xf32, #tpu.memory_space<vmem>>, vector<32x1xf32>
    %16 = vector.broadcast %15 : vector<32x1xf32> to vector<32x128xf32>
    %17 = arith.addf %14, %16 : vector<32x128xf32>
    %cst_13 = arith.constant 0.000000e+00 : f32
    %18 = vector.broadcast %cst_13 : f32 to vector<32x128xf32>
    %19 = arith.maximumf %17, %18 : vector<32x128xf32>
    %c0_14 = arith.constant 0 : index
    %c0_15 = arith.constant 0 : index
    %20 = vector.load %arg8[%c0_14, %c0_15] : memref<4x32xf32, #tpu.memory_space<vmem>>, vector<4x32xf32>
    %cst_16 = arith.constant dense<0.000000e+00> : vector<4x128xf32>
    %21 = tpu.matmul %20, %19, %cst_16 {dimension_numbers = #tpu.dot_dimension_numbers<[1], [0], [0], [1], [0, 0, 1, 1], [], []>} : vector<4x32xf32>, vector<32x128xf32>, vector<4x128xf32> -> vector<4x128xf32>
    %c0_17 = arith.constant 0 : index
    %c0_18 = arith.constant 0 : index
    %22 = vector.load %arg9[%c0_17, %c0_18] : memref<4x1xf32, #tpu.memory_space<vmem>>, vector<4x1xf32>
    %23 = vector.broadcast %22 : vector<4x1xf32> to vector<4x128xf32>
    %24 = arith.addf %21, %23 : vector<4x128xf32>
    %c0_19 = arith.constant 0 : index
    %c0_20 = arith.constant 0 : index
    %25 = vector.load %arg10[%c0_19, %c0_20] : memref<4x128xf32, #tpu.memory_space<vmem>>, vector<4x128xf32>
    tpu.vector_store %arg10[%c0_19, %c0_20], %24 {strides = array<i32>} : memref<4x128xf32, #tpu.memory_space<vmem>>, vector<4x128xf32>,
    return
  }
  func.func @transform_0(%arg0: i32) -> (i32, i32) {
    %c0_i32 = arith.constant 0 : i32
    %c0_i32_0 = arith.constant 0 : i32
    return %c0_i32, %arg0 : i32, i32
  }
  func.func @transform_1(%arg0: i32) -> (i32, i32) {
    %c0_i32 = arith.constant 0 : i32
    %c0_i32_0 = arith.constant 0 : i32
    return %c0_i32, %arg0 : i32, i32
  }
  func.func @transform_2(%arg0: i32) -> (i32, i32) {
    %c0_i32 = arith.constant 0 : i32
    %c0_i32_0 = arith.constant 0 : i32
    %c0_i32_1 = arith.constant 0 : i32
    return %c0_i32, %c0_i32_0 : i32, i32
  }
  func.func @transform_3(%arg0: i32) -> (i32, i32) {
    %c0_i32 = arith.constant 0 : i32
    %c0_i32_0 = arith.constant 0 : i32
    %c0_i32_1 = arith.constant 0 : i32
    return %c0_i32, %c0_i32_0 : i32, i32
  }
  func.func @transform_4(%arg0: i32) -> (i32, i32) {
    %c0_i32 = arith.constant 0 : i32
    %c0_i32_0 = arith.constant 0 : i32
    %c0_i32_1 = arith.constant 0 : i32
    return %c0_i32, %c0_i32_0 : i32, i32
  }
  func.func @transform_5(%arg0: i32) -> (i32, i32) {
    %c0_i32 = arith.constant 0 : i32
    %c0_i32_0 = arith.constant 0 : i32
    %c0_i32_1 = arith.constant 0 : i32
    return %c0_i32, %c0_i32_0 : i32, i32
  }
  func.func @transform_6(%arg0: i32) -> (i32, i32) {
    %c0_i32 = arith.constant 0 : i32
    %c0_i32_0 = arith.constant 0 : i32
    %c0_i32_1 = arith.constant 0 : i32
    return %c0_i32, %c0_i32_0 : i32, i32
  }
  func.func @transform_7(%arg0: i32) -> (i32, i32) {
    %c0_i32 = arith.constant 0 : i32
    %c0_i32_0 = arith.constant 0 : i32
    %c0_i32_1 = arith.constant 0 : i32
    return %c0_i32, %c0_i32_0 : i32, i32
  }
  func.func @transform_8(%arg0: i32) -> (i32, i32) {
    %c0_i32 = arith.constant 0 : i32
    %c0_i32_0 = arith.constant 0 : i32
    %c0_i32_1 = arith.constant 0 : i32
    return %c0_i32, %c0_i32_0 : i32, i32
  }
  func.func @transform_9(%arg0: i32) -> (i32, i32) {
    %c0_i32 = arith.constant 0 : i32
    %c0_i32_0 = arith.constant 0 : i32
    return %c0_i32, %arg0 : i32, i32
  }
}

</mosaic_0001>

<bundles_post_ra>
// kernel: _lambda_.20
= control target key start
LH: loop header
LB: loop body
LE: loop exit
PB: predicated region body
PF: predicated region fallthrough
CT: control target
= control target key end

     0   :  { %vm29_vm0 = vcmask 64512   ;;  %v131_v3 = vmov 0   ;;  %s173_s0 = inlined_call_operand.vmem [shape: f32[8,128], index: 0, kind: input, shape index: {}]   ;;  %s174_s1 = inlined_call_operand.vmem [shape: f32[16,8], index: 1, kind: input, shape index: {}]   ;;  %s175_s2 = inlined_call_operand.vmem [shape: f32[16,1], index: 2, kind: input, shape index: {}]   ;;  %s176_s3 = inlined_call_operand.vmem [shape: f32[16,128], index: 3, kind: output, shape index: {}]  }
   0x1   :  { %v16_v0 = vld [vmem:[%s173_s0] sm:$0xff]  ;;  %v15_v2 = vld [vmem:[%s174_s1 + $0x8] sm:$0xff]  ;;  %130 = vset.pattern.permute.xlu0 %v131_v3 }
   0x2   :  { %v14_v1 = vld [vmem:[%s174_s1] sm:$0xff]  ;;  %124 = vmatprep.subr.mxu0 %v16_v0  ;;  %v18_v5 = vld [vmem:[%s175_s2 + $0x8] sm:$0xff] }
   0x3   :  { %126 = vmatprep.mubr.msk.f32.mxu0 %vm29_vm0, %v14_v1  ;;  %v17_v4 = vld [vmem:[%s175_s2] sm:$0xff]  ;;  %125 = vmatpush3.msra.mxu0 %v16_v0 }
   0x4   :  { %21 = vperm.xlu0 %130, %v17_v4   ;;  %127 = vmatmul.mubr.msk.f32.vlgmr.msra.gmra.mxu0 %vm29_vm0, %v15_v2 }
   0x8   :  { %26 = vperm.xlu0 %130, %v18_v5  }
  0x7f   :  { %v22_v6 = vpop.permute.xlu0 %21 }
  0x83   :  { %v27_v7 = vpop.permute.xlu0 %26 }
  0xc4   :  { %v128_v8 = vpop.f32.mrf.mxu0 }
  0xc5   :  { %v108_v9 = vadd.f32 %v128_v8, %v27_v7 }
  0xc6   :  { %v102_v10 = vpop.f32.mrf.mxu0 }
  0xc7   :  { %v112_v11 = vmax.f32 %v108_v9, 0.0  ;;  %v103_v12 = vadd.f32 %v102_v10, %v22_v6 }
  0xc9   :  { %114 = vst [vmem:[%s176_s3 + $0x8] sm:$0xff] %v112_v11  ;;  %v111_v13 = vmax.f32 %v103_v12, 0.0 }
  0xcb   :  { %113 = vst [vmem:[%s176_s3] sm:$0xff] %v111_v13 }

// kernel: _lambda_.19
= control target key start
LH: loop header
LB: loop body
LE: loop exit
PB: predicated region body
PF: predicated region fallthrough
CT: control target
= control target key end

     0   :  { %s368_s12 = smov 0   ;;  %s391_s0 = inlined_call_operand.vmem [shape: f32[3,256], index: 0, kind: input, shape index: {}]   ;;  %s392_s1 = inlined_call_operand.vmem [shape: f32[8,3], index: 1, kind: input, shape index: {}]   ;;  %s393_s2 = inlined_call_operand.vmem [shape: f32[8,1], index: 2, kind: input, shape index: {}]   ;;  %s394_s3 = inlined_call_operand.vmem [shape: f32[8,256], index: 3, kind: output, shape index: {}]  }
   0x1 LB: > { %s307_s13 = sadd.s32 4294967295, %s343_s12   ;;  %p311_p0 = scmp.ge.s32.totalorder %s343_s12, 1  ;;  %s343_s12 = sphi %s368_s12, %s13_s12  }
   0x2   : > { %p136_p1 = scmp.lt.s32.totalorder %s343_s12, 3 }
   0x4   : > { %p137_p2 = pnand %p311_p0, %p136_p1 }
   0x5   : > { %p158_p3 = scmp.lt.s32.totalorder (!%p137_p2), %s307_s13, 1 }
   0x6   : > { %140 = sbr.rel (%p137_p2) target bundleno = 214 (0xd6), region = 32 }
   0xb   : > { %v345_v0 = vmov 0.0   ;;  %vm346_vm0 = vmmov 0   ;;  %v168_v1 = vld [vmem:[%s393_s2] sm:$0xff]  ;;  %s396_s13 = smov (!%p158_p3, %s307_s13), 1  ;;  %v347_v2 = vmov 0   ;;  %vm178_vm1 = vcmask 1042432  }
   0xc   : > { %320 = vmatprep.subr.mxu0 %v345_v0  ;;  %322 = vmatprep.mubr.msk.f32.mxu0 %vm346_vm0, %v345_v0  ;;  %s312_s16 = sshll.u32 %s396_s13, 2  ;;  %v166_v3 = vld [vmem:[%s392_s1] sm:$0xff]  ;;  %vm174_vm2 = vcmask 23552   ;;  %s313_s22 = sshll.u32 %s396_s13, 3 }
   0xd   : > { %336 = vset.pattern.permute.xlu0 %v347_v2  ;;  %s161_s19 = scalar_lea.vmem %s391_s0, %s312_s16  ;;  %s165_s25 = scalar_lea.vmem %s394_s3, %s313_s22 }
   0xe   : > { %171 = vperm.xlu0 %336, %v168_v1   ;;  %v167_v4 = vld [vmem:[%s161_s19] sm:$0x7] }
   0xf   : > { %321 = vmatpush3.msk.msra.mxu0 %vm178_vm1, %v167_v4 }
  0x10   : > { %323 = vmatmul.mubr.msk.f32.vlgmr.msra.gmra.mxu0 %vm174_vm2, %v166_v3 }
  0x89   : > { %v172_v5 = vpop.permute.xlu0 %171 }
  0xd0   : > { %v248_v6 = vpop.f32.mrf.mxu0 }
  0xd1   : > { %v249_v7 = vadd.f32 %v248_v6, %v172_v5 }
  0xd2   : > { %v324_v8 = vpop.f32.mrf.mxu0 }
  0xd3   : > { %v252_v9 = vmax.f32 %v249_v7, 0.0 }
  0xd5   : > { %253 = vst [vmem:[%s165_s25] sm:$0xff] %v252_v9 }
  0xd6 PF: > { %s13_s12 = sadd.s32 1, %s343_s12  }
  0xd7   : > { %p10_p4 = scmp.ge.s32.totalorder %s13_s12, 4  }
  0xd9   :  { %12 = sbr.rel (!%p10_p4) target bundleno = 1 (0x1), region = 62 }

// kernel: _lambda_.27
= control target key start
LH: loop header
LB: loop body
LE: loop exit
PB: predicated region body
PF: predicated region fallthrough
CT: control target
= control target key end

     0   :  { %s122_s1 = inlined_call_operand.vmem [shape: f32[8,128], index: 1, kind: input, shape index: {}, may-alias: {1,3}]   ;;  %s123_s0 = inlined_call_operand.vmem [shape: f32[8,128], index: 0, kind: input, shape index: {}, may-alias: {0,2}]   ;;  %s124_s3 = inlined_call_operand.vmem [shape: f32[8,128], index: 3, kind: input, shape index: {}, may-alias: {1,3}]   ;;  %s125_s2 = inlined_call_operand.vmem [shape: f32[8,128], index: 2, kind: input, shape index: {}, may-alias: {0,2}]   ;;  %s126_s6 = inlined_call_operand.vmem [shape: f32[8,128], index: 6, kind: output, shape index: {2}]   ;;  %s127_s5 = inlined_call_operand.vmem [shape: f32[8,128], index: 5, kind: output, shape index: {1}]   ;;  %s128_s4 = inlined_call_operand.vmem [shape: f32[8,128], index: 4, kind: output, shape index: {0}]  }
   0x1   :  { %v27_v0 = vld [vmem:[%s122_s1] sm:$0xff] }
   0x2   :  { %v57_v1 = vmul.f32 -1.442695, %v27_v0  ;;  %v20_v2 = vld [vmem:[%s123_s0] sm:$0xff] }
   0x3   :  { %v56_v3 = vmul.f32 -1.442695, %v20_v2  ;;  %v35_v8 = vld [vmem:[%s124_s3] sm:$0xff] }
   0x4   :  { %58 = vpow2.f32 %v57_v1  ;;  %v34_v10 = vld [vmem:[%s125_s2] sm:$0xff] }
   0x5   :  { %60 = vpow2.f32 %v56_v3 }
  0x11   :  { %v59_v4 = vpop.eup %58 }
  0x12   :  { %v61_v5 = vpop.eup %60  ;;  %v31_v6 = vadd.f32 1.0, %v59_v4 }
  0x13   :  { %v24_v7 = vadd.f32 1.0, %v61_v5 }
  0x14   :  { %62 = vrcp.f32 %v31_v6 }
  0x15   :  { %64 = vrcp.f32 %v24_v7 }
  0x21   :  { %v63_v9 = vpop.eup %62 }
  0x22   :  { %v65_v11 = vpop.eup %64  ;;  %v36_v12 = vmul.f32 %v63_v9, %v35_v8  ;;  %v37_v13 = vsub.f32 1.0, %v63_v9 }
  0x23   :  { %v41_v14 = vmul.f32 %v65_v11, %v34_v10 }
  0x24   :  { %v38_v15 = vmul.f32 %v37_v13, %v34_v10  ;;  %43 = vst [vmem:[%s126_s6] sm:$0xff] %v36_v12 }
  0x25   :  { %42 = vst [vmem:[%s127_s5] sm:$0xff] %v41_v14 }
  0x26   :  { %v39_v16 = vadd.f32 %v38_v15, %v36_v12 }
  0x28   :  { %40 = vst [vmem:[%s128_s4] sm:$0xff] %v39_v16 }

// kernel: _lambda_.21
= control target key start
LH: loop header
LB: loop body
LE: loop exit
PB: predicated region body
PF: predicated region fallthrough
CT: control target
= control target key end

     0   :  { %v181_v2 = vmov 0   ;;  %vm44_vm0 = vcmask 130048   ;;  %s244_s0 = inlined_call_operand.vmem [shape: f32[16,128], index: 0, kind: input, shape index: {}]   ;;  %s245_s1 = inlined_call_operand.vmem [shape: f32[32,16], index: 1, kind: input, shape index: {}]   ;;  %s246_s2 = inlined_call_operand.vmem [shape: f32[32,1], index: 2, kind: input, shape index: {}]   ;;  %s247_s3 = inlined_call_operand.vmem [shape: f32[32,128], index: 3, kind: output, shape index: {}]  }
   0x1   :  { %v19_v0 = vld [vmem:[%s244_s0 + $0x8] sm:$0xff]  ;;  %v18_v1 = vld [vmem:[%s244_s0] sm:$0xff]  ;;  %180 = vset.pattern.permute.xlu1 %v181_v2  ;;  %179 = vset.pattern.permute.xlu0 %v181_v2  ;;  %v16_v4 = vld [vmem:[%s245_s1 + $0x10] sm:$0xff] }
   0x2   :  { %164 = vmatprep.subr.mxu0 %v19_v0  ;;  %174 = vmatprep.subr.mxu1 %v19_v0  ;;  %v14_v3 = vld [vmem:[%s245_s1] sm:$0xff]  ;;  %v15_v5 = vld [vmem:[%s245_s1 + $0x8] sm:$0xff]  ;;  %v17_v6 = vld [vmem:[%s245_s1 + $0x18] sm:$0xff] }
   0x3   :  { %165 = vmatpush3.msra.mxu0 %v19_v0  ;;  %176 = vmatpush3.msra.mxu1 %v19_v0  ;;  %v22_v7 = vld [vmem:[%s246_s2 + $0x10] sm:$0xff]  ;;  %v20_v8 = vld [vmem:[%s246_s2] sm:$0xff]  ;;  %v23_v9 = vld [vmem:[%s246_s2 + $0x18] sm:$0xff] }
   0x4   :  { %166 = vmatprep.subr.mxu0 %v18_v1  ;;  %175 = vmatprep.subr.mxu1 %v18_v1  ;;  %v21_v10 = vld [vmem:[%s246_s2 + $0x8] sm:$0xff] }
   0x5   :  { %167 = vmatpush3.msra.mxu0 %v18_v1  ;;  %177 = vmatpush3.msra.mxu1 %v18_v1 }
   0x6   :  { %168 = vmatprep.mubr.msk.f32.mxu0 %vm44_vm0, %v14_v3  ;;  %171 = vmatprep.mubr.msk.f32.mxu1 %vm44_vm0, %v16_v4 }
   0x7   :  { %169 = vmatmul.mubr.msk.f32.vlgmr.msra.gmra.mxu0 %vm44_vm0, %v15_v5  ;;  %172 = vmatmul.mubr.msk.f32.vlgmr.msra.gmra.mxu1 %vm44_vm0, %v17_v6 }
   0x8   :  { %36 = vperm.xlu1 %180, %v22_v7   ;;  %26 = vperm.xlu0 %179, %v20_v8  }
   0xc   :  { %41 = vperm.xlu1 %180, %v23_v9   ;;  %31 = vperm.xlu0 %179, %v21_v10  }
  0x83   :  { %v37_v11 = vpop.permute.xlu1 %36  ;;  %v27_v12 = vpop.permute.xlu0 %26 }
  0x87   :  { %v42_v13 = vpop.permute.xlu1 %41  ;;  %v32_v14 = vpop.permute.xlu0 %31 }
  0xc7   :  { %v170_v15 = vpop.f32.mrf.mxu0  ;;  %v173_v16 = vpop.f32.mrf.mxu1 }
  0xc8   :  { %v129_v17 = vadd.f32 %v170_v15, %v32_v14  ;;  %v139_v18 = vadd.f32 %v173_v16, %v42_v13 }
  0xc9   :  { %v123_v19 = vpop.f32.mrf.mxu0  ;;  %v133_v20 = vpop.f32.mrf.mxu1 }
  0xca   :  { %v143_v21 = vmax.f32 %v129_v17, 0.0  ;;  %v145_v22 = vmax.f32 %v139_v18, 0.0  ;;  %v124_v23 = vadd.f32 %v123_v19, %v27_v12  ;;  %v134_v24 = vadd.f32 %v133_v20, %v37_v11 }
  0xcc   :  { %147 = vst [vmem:[%s247_s3 + $0x8] sm:$0xff] %v143_v21  ;;  %149 = vst [vmem:[%s247_s3 + $0x18] sm:$0xff] %v145_v22  ;;  %v142_v25 = vmax.f32 %v124_v23, 0.0  ;;  %v144_v26 = vmax.f32 %v134_v24, 0.0 }
  0xce   :  { %146 = vst [vmem:[%s247_s3] sm:$0xff] %v142_v25  ;;  %148 = vst [vmem:[%s247_s3 + $0x10] sm:$0xff] %v144_v26 }

// kernel: _lambda_.29
= control target key start
LH: loop header
LB: loop body
LE: loop exit
PB: predicated region body
PF: predicated region fallthrough
CT: control target
= control target key end

     0   :  { %v250_v3 = vmov 0   ;;  %vm30_vm0 = vcmask 130048   ;;  %vm112_vm1 = vcmask 261120   ;;  %s323_s0 = inlined_call_operand.vmem [shape: f32[32,128], index: 0, kind: input, shape index: {}]   ;;  %s324_s2 = inlined_call_operand.vmem [shape: f32[16,128], index: 2, kind: input, shape index: {}]   ;;  %s325_s3 = inlined_call_operand.vmem [shape: f32[16,16], index: 3, kind: input, shape index: {}]   ;;  %s326_s1 = inlined_call_operand.vmem [shape: f32[16,32], index: 1, kind: input, shape index: {}]   ;;  %s327_s4 = inlined_call_operand.vmem [shape: f32[16,1], index: 4, kind: input, shape index: {}]   ;;  %s328_s5 = inlined_call_operand.vmem [shape: f32[16,128], index: 5, kind: output, shape index: {}]  }
   0x1   :  { %v25_v0 = vld [vmem:[%s323_s0 + $0x18] sm:$0xff]  ;;  %v29_v1 = vld [vmem:[%s324_s2 + $0x8] sm:$0xff]  ;;  %v24_v2 = vld [vmem:[%s323_s0 + $0x10] sm:$0xff]  ;;  %249 = vset.pattern.permute.xlu0 %v250_v3 }
   0x2   :  { %237 = vmatprep.subr.mxu1 %v25_v0  ;;  %230 = vmatprep.subr.mxu0 %v29_v1  ;;  %v28_v4 = vld [vmem:[%s324_s2] sm:$0xff]  ;;  %v23_v5 = vld [vmem:[%s323_s0 + $0x8] sm:$0xff] }
   0x3   :  { %238 = vmatpush3.msra.mxu1 %v25_v0  ;;  %231 = vmatpush3.msra.mxu0 %v29_v1  ;;  %v26_v6 = vld [vmem:[%s325_s3] sm:$0xff]  ;;  %v27_v7 = vld [vmem:[%s325_s3 + $0x8] sm:$0xff] }
   0x4   :  { %239 = vmatprep.subr.mxu1 %v24_v2  ;;  %232 = vmatprep.subr.mxu0 %v28_v4  ;;  %v22_v8 = vld [vmem:[%s323_s0] sm:$0xff]  ;;  %v21_v11 = vld [vmem:[%s326_s1 + $0x8] sm:$0xff] }
   0x5   :  { %240 = vmatpush3.msra.mxu1 %v24_v2  ;;  %233 = vmatpush3.msra.mxu0 %v28_v4  ;;  %v20_v9 = vld [vmem:[%s326_s1] sm:$0xff]  ;;  %v195_v12 = vld [vmem:[%s327_s4 + $0x8] sm:$0xff] }
   0x6   :  { %241 = vmatprep.subr.mxu1 %v23_v5  ;;  %234 = vmatprep.mubr.msk.f32.mxu0 %vm30_vm0, %v26_v6  ;;  %v194_v10 = vld [vmem:[%s327_s4] sm:$0xff] }
   0x7   :  { %242 = vmatpush3.msra.mxu1 %v23_v5  ;;  %235 = vmatmul.mubr.msk.f32.vlgmr.msra.gmra.mxu0 %vm30_vm0, %v27_v7 }
   0x8   :  { %243 = vmatprep.subr.mxu1 %v22_v8  ;;  %245 = vmatprep.mubr.msk.f32.mxu1 %vm112_vm1, %v20_v9 }
   0x9   :  { %244 = vmatpush3.msra.mxu1 %v22_v8  ;;  %198 = vperm.xlu0 %249, %v194_v10  }
   0xa   :  { %246 = vmatmul.mubr.msk.f32.vlgmr.msra.gmra.mxu1 %vm112_vm1, %v21_v11 }
   0xd   :  { %203 = vperm.xlu0 %249, %v195_v12  }
  0x84   :  { %v199_v13 = vpop.permute.xlu0 %198 }
  0x88   :  { %v204_v16 = vpop.permute.xlu0 %203 }
  0xc7   :  { %v236_v14 = vpop.f32.mrf.mxu0 }
  0xc9   :  { %v103_v18 = vpop.f32.mrf.mxu0 }
  0xca   :  { %v247_v15 = vpop.f32.mrf.mxu1 }
  0xcb   :  { %v191_v17 = vadd.f32 %v247_v15, %v236_v14 }
  0xcc   :  { %v185_v19 = vpop.f32.mrf.mxu1 }
  0xcd   :  { %v207_v20 = vadd.f32 %v204_v16, %v191_v17  ;;  %v186_v21 = vadd.f32 %v185_v19, %v103_v18 }
  0xcf   :  { %v209_v22 = vmax.f32 %v207_v20, 0.0  ;;  %v206_v23 = vadd.f32 %v199_v13, %v186_v21 }
  0xd1   :  { %211 = vst [vmem:[%s328_s5 + $0x8] sm:$0xff] %v209_v22  ;;  %v208_v24 = vmax.f32 %v206_v23, 0.0 }
  0xd3   :  { %210 = vst [vmem:[%s328_s5] sm:$0xff] %v208_v24 }

// kernel: _lambda_.30
= control target key start
LH: loop header
LB: loop body
LE: loop exit
PB: predicated region body
PF: predicated region fallthrough
CT: control target
= control target key end

     0   :  { %vm25_vm0 = vcmask 64512   ;;  %v209_v0 = vmov 0.0   ;;  %vm210_vm1 = vmmov 0   ;;  %vm99_vm2 = vcmask 130048   ;;  %s263_s2 = inlined_call_operand.vmem [shape: f32[8,128], index: 2, kind: input, shape index: {}]   ;;  %s264_s0 = inlined_call_operand.vmem [shape: f32[16,128], index: 0, kind: input, shape index: {}]   ;;  %s265_s3 = inlined_call_operand.vmem [shape: f32[8,8], index: 3, kind: input, shape index: {}]   ;;  %s266_s1 = inlined_call_operand.vmem [shape: f32[8,16], index: 1, kind: input, shape index: {}]   ;;  %s267_s4 = inlined_call_operand.vmem [shape: f32[8,1], index: 4, kind: input, shape index: {}]   ;;  %s268_s5 = inlined_call_operand.vmem [shape: f32[8,128], index: 5, kind: output, shape index: {}]  }
   0x1   :  { %193 = vmatprep.subr.mxu0 %v209_v0  ;;  %198 = vmatprep.subr.mxu1 %v209_v0  ;;  %v24_v1 = vld [vmem:[%s263_s2] sm:$0xff]  ;;  %v22_v2 = vld [vmem:[%s264_s0 + $0x8] sm:$0xff]  ;;  %v211_v7 = vmov 0  }
   0x2   :  { %v23_v3 = vld [vmem:[%s265_s3] sm:$0xff]  ;;  %194 = vmatpush3.msra.mxu0 %v24_v1  ;;  %195 = vmatprep.mubr.msk.f32.mxu0 %vm210_vm1, %v209_v0 }
   0x3   :  { %v21_v4 = vld [vmem:[%s264_s0] sm:$0xff]  ;;  %199 = vmatpush3.msra.mxu1 %v22_v2  ;;  %196 = vmatmul.mubr.msk.f32.vlgmr.msra.gmra.mxu0 %vm25_vm0, %v23_v3 }
   0x4   :  { %v20_v5 = vld [vmem:[%s266_s1] sm:$0xff]  ;;  %200 = vmatprep.subr.mxu1 %v209_v0  ;;  %202 = vmatprep.mubr.msk.f32.mxu1 %vm210_vm1, %v209_v0 }
   0x5   :  { %v173_v6 = vld [vmem:[%s267_s4] sm:$0xff]  ;;  %201 = vmatpush3.msra.mxu1 %v21_v4  ;;  %208 = vset.pattern.permute.xlu0 %v211_v7 }
   0x6   :  { %203 = vmatmul.mubr.msk.f32.vlgmr.msra.gmra.mxu1 %vm99_vm2, %v20_v5  ;;  %176 = vperm.xlu0 %208, %v173_v6  }
  0x81   :  { %v177_v11 = vpop.permute.xlu0 %176 }
  0xc3   :  { %v95_v8 = vpop.f32.mrf.mxu0 }
  0xc5   :  { %v197_v9 = vpop.f32.mrf.mxu0 }
  0xc6   :  { %v169_v10 = vpop.f32.mrf.mxu1 }
  0xc7   :  { %v170_v12 = vadd.f32 %v169_v10, %v95_v8 }
  0xc8   :  { %v204_v13 = vpop.f32.mrf.mxu1 }
  0xc9   :  { %v179_v14 = vadd.f32 %v177_v11, %v170_v12 }
  0xcb   :  { %v180_v15 = vmax.f32 %v179_v14, 0.0 }
  0xcd   :  { %181 = vst [vmem:[%s268_s5] sm:$0xff] %v180_v15 }

// kernel: _lambda_.31
= control target key start
LH: loop header
LB: loop body
LE: loop exit
PB: predicated region body
PF: predicated region fallthrough
CT: control target
= control target key end

     0   :  { %s561_s18 = smov 0   ;;  %s594_s0 = inlined_call_operand.vmem [shape: f32[8,512], index: 0, kind: input, shape index: {}]   ;;  %s595_s1 = inlined_call_operand.vmem [shape: f32[8,8], index: 1, kind: input, shape index: {}]   ;;  %s596_s2 = inlined_call_operand.vmem [shape: f32[3,512], index: 2, kind: input, shape index: {}]   ;;  %s597_s3 = inlined_call_operand.vmem [shape: f32[8,3], index: 3, kind: input, shape index: {}]   ;;  %s598_s4 = inlined_call_operand.vmem [shape: f32[8,1], index: 4, kind: input, shape index: {}]   ;;  %s599_s5 = inlined_call_operand.vmem [shape: f32[8,512], index: 5, kind: output, shape index: {}]  }
   0x1 LB: > { %s492_s19 = sadd.s32 4294967295, %s527_s18   ;;  %p496_p0 = scmp.ge.s32.totalorder %s527_s18, 1  ;;  %s527_s18 = sphi %s561_s18, %s15_s18  }
   0x2   : > { %p199_p1 = scmp.lt.s32.totalorder %s527_s18, 3 }
   0x4   : > { %p200_p2 = pnand %p496_p0, %p199_p1 }
   0x5   : > { %s497_s20 = sshll.u32 (!%p200_p2), %s492_s19, 1 }
   0x6   : > { %203 = sbr.rel (%p200_p2) target bundleno = 222 (0xde), region = 40  ;;  %p233_p3 = scmp.lt.s32.totalorder (!%p200_p2), %s497_s20, 3 }
   0xb   : > { %v529_v0 = vmov 0.0   ;;  %v412_v1 = vld [vmem:[%s598_s4] sm:$0xff]  ;;  %v530_v2 = vmov 0   ;;  %s601_s20 = smov (!%p233_p3, %s497_s20), 3  ;;  %vm337_vm0 = vcmask 64512   ;;  %vm261_vm1 = vcmask 1042432  }
   0xc   : > { %405 = vmatprep.mubr.f32.mxu1 %v529_v0  ;;  %330 = vmatprep.mubr.f32.mxu0 %v529_v0  ;;  %s498_s23 = sshll.u32 %s601_s20, 3  ;;  %s500_s24 = sshll.u32 %s601_s20, 2  ;;  %v250_v5 = vld [vmem:[%s595_s1] sm:$0xff]  ;;  %vm257_vm2 = vcmask 23552  }
   0xd   : > { %519 = vset.pattern.permute.xlu0 %v530_v2  ;;  %s236_s27 = scalar_lea.vmem %s594_s0, %s498_s23  ;;  %s242_s30 = scalar_lea.vmem %s596_s2, %s500_s24  ;;  %v253_v8 = vld [vmem:[%s597_s3] sm:$0xff] }
   0xe   : > { %415 = vperm.xlu0 %519, %v412_v1   ;;  %v252_v3 = vld [vmem:[%s236_s27 + $0x8] sm:$0xff]  ;;  %v251_v4 = vld [vmem:[%s236_s27] sm:$0xff]  ;;  %s248_s12 = scalar_lea.vmem %s599_s5, %s498_s23 }
   0xf   : > { %371 = vmatprep.subr.mxu1 %v252_v3  ;;  %v254_v6 = vld [vmem:[%s242_s30] sm:$0x77] }
  0x10   : > { %372 = vmatpush1.msra.mxu1 %v251_v4  ;;  %v256_v7 = vcombine.high %v254_v6, %v254_v6 }
  0x11   : > { %506 = vmatmul.mubr.msk.f32.vlgmr.msra.gmra.mxu1 %vm337_vm0, %v250_v5 }
  0x12   : > { %503 = vmatprep.subr.msk.mxu0 %vm261_vm1, %v256_v7 }
  0x13   : > { %504 = vmatpush1.msk.msra.mxu0 %vm261_vm1, %v254_v6 }
  0x14   : > { %505 = vmatmul.mubr.msk.f32.vlgmr.msra.gmra.mxu0 %vm257_vm2, %v253_v8 }
  0x89   : > { %v416_v11 = vpop.permute.xlu0 %415 }
  0xd1   : > { %v407_v9 = vpop.f32.mrf.mxu1 }
  0xd3   : > { %v409_v13 = vpop.f32.mrf.mxu1 }
  0xd4   : > { %v332_v10 = vpop.f32.mrf.mxu0 }
  0xd5   : > { %v408_v12 = vadd.f32 %v407_v9, %v332_v10 }
  0xd6   : > { %v334_v14 = vpop.f32.mrf.mxu0 }
  0xd7   : > { %v418_v15 = vadd.f32 %v416_v11, %v408_v12  ;;  %v410_v16 = vadd.f32 %v409_v13, %v334_v14 }
  0xd9   : > { %v420_v17 = vmax.f32 %v418_v15, 0.0  ;;  %v419_v18 = vadd.f32 %v416_v11, %v410_v16 }
  0xdb   : > { %422 = vst [vmem:[%s248_s12] sm:$0xff] %v420_v17  ;;  %v421_v19 = vmax.f32 %v419_v18, 0.0 }
  0xdd   : > { %423 = vst [vmem:[%s248_s12 + $0x8] sm:$0xff] %v421_v19 }
  0xde PF: > { %s15_s18 = sadd.s32 1, %s527_s18  }
  0xdf   : > { %p12_p4 = scmp.ge.s32.totalorder %s15_s18, 4  }
  0xe1   :  { %14 = sbr.rel (!%p12_p4) target bundleno = 1 (0x1), region = 73 }

// kernel: _lambda_.32
= control target key start
LH: loop header
LB: loop body
LE: loop exit
PB: predicated region body
PF: predicated region fallthrough
CT: control target
= control target key end

     0   :  { %s392_s14 = smov 0   ;;  %s412_s0 = inlined_call_operand.vmem [shape: f32[8,512], index: 0, kind: input, shape index: {}]   ;;  %s413_s1 = inlined_call_operand.vmem [shape: f32[1,8], index: 1, kind: input, shape index: {}]   ;;  %s414_s2 = inlined_call_operand.<no memory space> [shape: f32[1,1], index: 2, kind: input, shape index: {}]   ;;  %s415_s3 = inlined_call_operand.vmem [shape: f32[1,512], index: 3, kind: output, shape index: {}]  }
   0x1   :  { %v8_v0 = vstv %s414_s2 }
   0x2   :  { %9 = vst [vmem:[#allocation2] sm:$0x1] %v8_v0 }
   0x3 LB: > { %s335_s15 = sadd.s32 4294967295, %s364_s14   ;;  %p339_p0 = scmp.ge.s32.totalorder %s364_s14, 1  ;;  %s364_s14 = sphi %s392_s14, %s15_s14  }
   0x4   : > { %p140_p1 = scmp.lt.s32.totalorder %s364_s14, 3 }
   0x6   : > { %p141_p2 = pnand %p339_p0, %p140_p1 }
   0x7   : > { %s340_s16 = sshll.u32 (!%p141_p2), %s335_s15, 1 }
   0x8   : > { %144 = sbr.rel (%p141_p2) target bundleno = 223 (0xdf), region = 32  ;;  %p164_p3 = scmp.lt.s32.totalorder (!%p141_p2), %s340_s16, 3 }
   0xd   : > { %v366_v1 = vmov 0.0   ;;  %v367_v2 = vmov 0   ;;  %v177_v3 = vld [vmem:[#allocation2] sm:$0x1]  ;;  %s417_s16 = smov (!%p164_p3, %s340_s16), 3  ;;  %vm187_vm0 = vcmask 64512   ;;  %v183_v7 = vlaneseq }
   0xe   : > { %255 = vmatprep.mubr.f32.mxu0 %v366_v1  ;;  %357 = vset.pattern.permute.xlu0 %v367_v2  ;;  %s341_s2 = sshll.u32 %s417_s16, 3  ;;  %v174_v6 = vld [vmem:[%s413_s1] sm:$0x1]  ;;  %v368_v10 = vmov 1966171168   ;;  %s172_s24 = scalar_lea.vmem %s415_s3, %s417_s16 }
   0xf   : > { %180 = vperm.xlu0 %357, %v177_v3   ;;  %s167_s19 = scalar_lea.vmem %s412_s0, %s341_s2  ;;  %v184_v8 = vshrl.u32 %v183_v7, 7  ;;  %v266_v11 = vunpack.c.l.s4 %v368_v10  ;;  %vm282_vm1 = vcmp.lt.s32.totalorder %v183_v7, 256 }
  0x10   : > { %v176_v4 = vld [vmem:[%s167_s19 + $0x8] sm:$0xff]  ;;  %v175_v5 = vld [vmem:[%s167_s19] sm:$0xff] }
  0x11   : > { %221 = vmatprep.subr.mxu0 %v176_v4  ;;  %v185_v9 = vsub.s32 0, %v184_v8  ;;  %v267_v14 = vunpack.c.0.s8 %v266_v11 }
  0x12   : > { %222 = vmatpush1.msra.mxu0 %v175_v5 }
  0x13   : > { %343 = vmatmul.mubr.msk.f32.vlgmr.msra.gmra.mxu0 %vm187_vm0, %v174_v6  ;;  %v270_v19 = vsub.s32 %v267_v14, %v184_v8 }
  0x8a   : > { %v181_v12 = vpop.permute.xlu0 %180 }
  0x8b   : > { %v186_v13 = vrot.slane %v181_v12, %v185_v9 }
  0xd3   : > { %v257_v15 = vpop.f32.mrf.mxu0 }
  0xd4   : > { %v258_v17 = vadd.f32 %v257_v15, %v186_v13 }
  0xd5   : > { %v259_v16 = vpop.f32.mrf.mxu0 }
  0xd6   : > { %v260_v18 = vadd.f32 %v259_v16, %v186_v13 }
  0xd8   : > { %v264_v20 = vcombine.low %v258_v17, %v260_v18 }
  0xda   : > { %v271_v21 = vrot.slane %v264_v20, %v270_v19 }
  0xdc   : > { %v278_v22 = vrot.slane %v271_v21, %v270_v19 }
  0xde   : > { %284 = vst.msk [vmem:[%s172_s24] sm:$0x3] %vm282_vm1, %v278_v22 }
  0xdf PF: > { %s15_s14 = sadd.s32 1, %s364_s14  }
  0xe0   : > { %p12_p4 = scmp.ge.s32.totalorder %s15_s14, 4  }
  0xe2   :  { %14 = sbr.rel (!%p12_p4) target bundleno = 3 (0x3), region = 62 }

// kernel: _lambda_.34
= control target key start
LH: loop header
LB: loop body
LE: loop exit
PB: predicated region body
PF: predicated region fallthrough
CT: control target
= control target key end

     0   :  { %s628_s18 = smov 0   ;;  %s630_s19 = smov 0   ;;  %s694_s0 = inlined_call_operand.vmem [shape: f32[16,256], index: 0, kind: input, shape index: {}]   ;;  %s695_s1 = inlined_call_operand.vmem [shape: f32[8,16], index: 1, kind: input, shape index: {}]   ;;  %s696_s2 = inlined_call_operand.vmem [shape: f32[8,256], index: 2, kind: input, shape index: {}]   ;;  %s697_s3 = inlined_call_operand.vmem [shape: f32[8,8], index: 3, kind: input, shape index: {}]   ;;  %s698_s4 = inlined_call_operand.vmem [shape: f32[8,1], index: 4, kind: input, shape index: {}]   ;;  %s699_s5 = inlined_call_operand.vmem [shape: f32[8,256], index: 5, kind: output, shape index: {}]  }
   0x1   :  { %s632_s20 = smov 0  }
   0x2 LB: > { %s512_s21 = sadd.s32 4294967295, %s593_s20   ;;  %s645_s22 = sadd.s32 1, %s593_s20   ;;  %s593_s20 = sphi %s632_s20, %s702_s20   ;;  %s589_s19 = sphi %s630_s19, %s701_s19   ;;  %s585_s18 = sphi %s628_s18, %s700_s18  }
   0x3   : > { %s19_s23 = ssub.s32 %s593_s20, %s645_s22  ;;  %s22_s24 = sadd.s32 1, %s589_s19 }
   0x4   : > { %p20_p0 = scmp.eq.s32.totalorder %s19_s23, 0  ;;  %p29_p1 = scmp.ne.s32.totalorder %s589_s19, %s585_s18 }
   0x5   : > { %p30_p2 = scmp.eq.s32.totalorder %s593_s20, 0  ;;  %p515_p4 = scmp.ge.s32.totalorder %s593_s20, 2 }
   0x6   : > { %s654_s25 = scalar_select %p20_p0, %s589_s19, %s22_s24  }
   0x7   : > { %p31_p3 = por %p30_p2, %p29_p1  ;;  %179 = sbr.rel (%p515_p4) target bundleno = 17 (0x11), region = 28 }
   0xc   : > { %182 = sbr.rel (!%p31_p3) target bundleno = 17 (0x11), region = 32  ;;  %s184_s26 = sand.u32 (%p31_p3), 1, %s589_s19  }
   0xd   : > { %s517_s27 = sshll.u32 (%p31_p3), %s593_s20, 3  ;;  %s516_s28 = sshll.u32 (%p31_p3), %s184_s26, 4 }
   0xe   : > { %s188_s6 = scalar_lea.vmem (%p31_p3), %s694_s0, %s517_s27  ;;  %s186_s7 = scalar_lea.vmem (%p31_p3), [#allocation2], %s516_s28 }
   0xf   : > { %v219_v0 = vld [vmem:[%s188_s6] sm:$0xff] (%p31_p3)  ;;  %v221_v1 = vld [vmem:[%s188_s6 + $0x10] sm:$0xff] (%p31_p3) }
  0x10   : > { %220 = vst [vmem:[%s186_s7] sm:$0xff] (%p31_p3), %v219_v0  ;;  %222 = vst [vmem:[%s186_s7 + $0x8] sm:$0xff] (%p31_p3), %v221_v1 }
  0x11 PF: > { %p518_p5 = scmp.ge.s32.totalorder %s593_s20, 1  ;;  %p234_p6 = scmp.lt.s32.totalorder %s593_s20, 3 }
  0x13   : > { %p235_p7 = pnand %p518_p5, %p234_p6 }
  0x14   : > { %s241_s8 = sand.u32 (!%p235_p7), 1, %s585_s18   ;;  %p271_p8 = scmp.lt.s32.totalorder (!%p235_p7), %s512_s21, 1 }
  0x15   : > { %238 = sbr.rel (%p235_p7) target bundleno = 232 (0xe8), region = 74  ;;  %s519_s9 = sshll.u32 (!%p235_p7), %s241_s8, 4 }
  0x16   : > { %s243_s12 = scalar_lea.vmem (!%p235_p7), [#allocation2], %s519_s9 }
  0x1a   : > { %v595_v2 = vmov 0.0   ;;  %v432_v3 = vld [vmem:[%s698_s4] sm:$0xff]  ;;  %vm596_vm0 = vmmov 0   ;;  %v281_v4 = vld [vmem:[%s243_s12 + $0x8] sm:$0xff]  ;;  %s704_s21 = smov (!%p271_p8, %s512_s21), 1  ;;  %v597_v6 = vmov 0  }
  0x1b   : > { %536 = vmatprep.subr.mxu1 %v595_v2  ;;  %531 = vmatprep.subr.mxu0 %v595_v2  ;;  %v280_v5 = vld [vmem:[%s243_s12] sm:$0xff]  ;;  %vm358_vm1 = vcmask 130048   ;;  %s520_s15 = sshll.u32 %s704_s21, 3  ;;  %vm284_vm2 = vcmask 64512  }
  0x1c   : > { %540 = vmatprep.mubr.msk.f32.mxu1 %vm596_vm0, %v595_v2  ;;  %533 = vmatprep.mubr.msk.f32.mxu0 %vm596_vm0, %v595_v2  ;;  %v279_v7 = vld [vmem:[%s695_s1] sm:$0xff]  ;;  %s274_s18 = scalar_lea.vmem %s696_s2, %s520_s15  ;;  %s278_s26 = scalar_lea.vmem %s699_s5, %s520_s15 }
  0x1d   : > { %570 = vset.pattern.permute.xlu0 %v597_v6  ;;  %537 = vmatpush3.msra.mxu1 %v281_v4  ;;  %v282_v8 = vld [vmem:[%s697_s3] sm:$0xff] }
  0x1e   : > { %435 = vperm.xlu0 %570, %v432_v3   ;;  %538 = vmatprep.subr.mxu1 %v595_v2  ;;  %v283_v9 = vld [vmem:[%s274_s18] sm:$0xff] }
  0x1f   : > { %539 = vmatpush3.msra.mxu1 %v280_v5  ;;  %532 = vmatpush3.msra.mxu0 %v283_v9 }
  0x20   : > { %541 = vmatmul.mubr.msk.f32.vlgmr.msra.gmra.mxu1 %vm358_vm1, %v279_v7  ;;  %534 = vmatmul.mubr.msk.f32.vlgmr.msra.gmra.mxu0 %vm284_vm2, %v282_v8 }
  0x99   : > { %v436_v11 = vpop.permute.xlu0 %435 }
  0xe0   : > { %v428_v10 = vpop.f32.mrf.mxu1  ;;  %v354_v12 = vpop.f32.mrf.mxu0 }
  0xe1   : > { %v429_v14 = vadd.f32 %v428_v10, %v354_v12 }
  0xe2   : > { %v542_v13 = vpop.f32.mrf.mxu1  ;;  %v535_v15 = vpop.f32.mrf.mxu0 }
  0xe3   : > { %v438_v16 = vadd.f32 %v436_v11, %v429_v14 }
  0xe5   : > { %v439_v17 = vmax.f32 %v438_v16, 0.0 }
  0xe7   : > { %440 = vst [vmem:[%s278_s26] sm:$0xff] %v439_v17 }
  0xe8 PF: > { %p12_p9 = scmp.ge.s32.totalorder %s645_s22, 4   ;;  %s700_s18 = smov %s589_s19 }
  0xe9   : > { %s701_s19 = smov %s654_s25  ;;  %s702_s20 = smov %s645_s22 }
  0xea   :  { %14 = sbr.rel (!%p12_p9) target bundleno = 2 (0x2), region = 116 }

// kernel: _lambda_.35
= control target key start
LH: loop header
LB: loop body
LE: loop exit
PB: predicated region body
PF: predicated region fallthrough
CT: control target
= control target key end

     0   :  { %s561_s18 = smov 0   ;;  %s594_s0 = inlined_call_operand.vmem [shape: f32[8,768], index: 0, kind: input, shape index: {}]   ;;  %s595_s1 = inlined_call_operand.vmem [shape: f32[8,8], index: 1, kind: input, shape index: {}]   ;;  %s596_s2 = inlined_call_operand.vmem [shape: f32[3,768], index: 2, kind: input, shape index: {}]   ;;  %s597_s3 = inlined_call_operand.vmem [shape: f32[8,3], index: 3, kind: input, shape index: {}]   ;;  %s598_s4 = inlined_call_operand.vmem [shape: f32[8,1], index: 4, kind: input, shape index: {}]   ;;  %s599_s5 = inlined_call_operand.vmem [shape: f32[8,768], index: 5, kind: output, shape index: {}]  }
   0x1 LB: > { %s492_s19 = sadd.s32 4294967295, %s527_s18   ;;  %p496_p0 = scmp.ge.s32.totalorder %s527_s18, 1  ;;  %s527_s18 = sphi %s561_s18, %s15_s18  }
   0x2   : > { %p199_p1 = scmp.lt.s32.totalorder %s527_s18, 4 }
   0x4   : > { %p200_p2 = pnand %p496_p0, %p199_p1 }
   0x5   : > { %s497_s20 = sshll.u32 (!%p200_p2), %s492_s19, 1 }
   0x6   : > { %203 = sbr.rel (%p200_p2) target bundleno = 222 (0xde), region = 40  ;;  %p233_p3 = scmp.lt.s32.totalorder (!%p200_p2), %s497_s20, 5 }
   0xb   : > { %v529_v0 = vmov 0.0   ;;  %v412_v1 = vld [vmem:[%s598_s4] sm:$0xff]  ;;  %v530_v2 = vmov 0   ;;  %s601_s20 = smov (!%p233_p3, %s497_s20), 5  ;;  %vm337_vm0 = vcmask 64512   ;;  %vm261_vm1 = vcmask 1042432  }
   0xc   : > { %405 = vmatprep.mubr.f32.mxu1 %v529_v0  ;;  %330 = vmatprep.mubr.f32.mxu0 %v529_v0  ;;  %s498_s23 = sshll.u32 %s601_s20, 3  ;;  %s500_s24 = sshll.u32 %s601_s20, 2  ;;  %v250_v5 = vld [vmem:[%s595_s1] sm:$0xff]  ;;  %vm257_vm2 = vcmask 23552  }
   0xd   : > { %519 = vset.pattern.permute.xlu0 %v530_v2  ;;  %s236_s27 = scalar_lea.vmem %s594_s0, %s498_s23  ;;  %s242_s30 = scalar_lea.vmem %s596_s2, %s500_s24  ;;  %v253_v8 = vld [vmem:[%s597_s3] sm:$0xff] }
   0xe   : > { %415 = vperm.xlu0 %519, %v412_v1   ;;  %v252_v3 = vld [vmem:[%s236_s27 + $0x8] sm:$0xff]  ;;  %v251_v4 = vld [vmem:[%s236_s27] sm:$0xff]  ;;  %s248_s12 = scalar_lea.vmem %s599_s5, %s498_s23 }
   0xf   : > { %371 = vmatprep.subr.mxu1 %v252_v3  ;;  %v254_v6 = vld [vmem:[%s242_s30] sm:$0x77] }
  0x10   : > { %372 = vmatpush1.msra.mxu1 %v251_v4  ;;  %v256_v7 = vcombine.high %v254_v6, %v254_v6 }
  0x11   : > { %506 = vmatmul.mubr.msk.f32.vlgmr.msra.gmra.mxu1 %vm337_vm0, %v250_v5 }
  0x12   : > { %503 = vmatprep.subr.msk.mxu0 %vm261_vm1, %v256_v7 }
  0x13   : > { %504 = vmatpush1.msk.msra.mxu0 %vm261_vm1, %v254_v6 }
  0x14   : > { %505 = vmatmul.mubr.msk.f32.vlgmr.msra.gmra.mxu0 %vm257_vm2, %v253_v8 }
  0x89   : > { %v416_v11 = vpop.permute.xlu0 %415 }
  0xd1   : > { %v407_v9 = vpop.f32.mrf.mxu1 }
  0xd3   : > { %v409_v13 = vpop.f32.mrf.mxu1 }
  0xd4   : > { %v332_v10 = vpop.f32.mrf.mxu0 }
  0xd5   : > { %v408_v12 = vadd.f32 %v407_v9, %v332_v10 }
  0xd6   : > { %v334_v14 = vpop.f32.mrf.mxu0 }
  0xd7   : > { %v418_v15 = vadd.f32 %v416_v11, %v408_v12  ;;  %v410_v16 = vadd.f32 %v409_v13, %v334_v14 }
  0xd9   : > { %v420_v17 = vmax.f32 %v418_v15, 0.0  ;;  %v419_v18 = vadd.f32 %v416_v11, %v410_v16 }
  0xdb   : > { %422 = vst [vmem:[%s248_s12] sm:$0xff] %v420_v17  ;;  %v421_v19 = vmax.f32 %v419_v18, 0.0 }
  0xdd   : > { %423 = vst [vmem:[%s248_s12 + $0x8] sm:$0xff] %v421_v19 }
  0xde PF: > { %s15_s18 = sadd.s32 1, %s527_s18  }
  0xdf   : > { %p12_p4 = scmp.ge.s32.totalorder %s15_s18, 5  }
  0xe1   :  { %14 = sbr.rel (!%p12_p4) target bundleno = 1 (0x1), region = 73 }

// kernel: _lambda_.36
= control target key start
LH: loop header
LB: loop body
LE: loop exit
PB: predicated region body
PF: predicated region fallthrough
CT: control target
= control target key end

     0   :  { %s372_s12 = smov 0   ;;  %s395_s0 = inlined_call_operand.vmem [shape: f32[8,768], index: 0, kind: input, shape index: {}]   ;;  %s396_s1 = inlined_call_operand.vmem [shape: f32[4,8], index: 1, kind: input, shape index: {}]   ;;  %s397_s2 = inlined_call_operand.vmem [shape: f32[4,1], index: 2, kind: input, shape index: {}]   ;;  %s398_s3 = inlined_call_operand.vmem [shape: f32[4,768], index: 3, kind: output, shape index: {}]  }
   0x1 LB: > { %s319_s13 = sadd.s32 4294967295, %s348_s12   ;;  %p323_p0 = scmp.ge.s32.totalorder %s348_s12, 1  ;;  %s348_s12 = sphi %s372_s12, %s13_s12  }
   0x2   : > { %p138_p1 = scmp.lt.s32.totalorder %s348_s12, 4 }
   0x4   : > { %p139_p2 = pnand %p323_p0, %p138_p1 }
   0x5   : > { %s324_s14 = sshll.u32 (!%p139_p2), %s319_s13, 1 }
   0x6   : > { %142 = sbr.rel (%p139_p2) target bundleno = 217 (0xd9), region = 32  ;;  %p163_p3 = scmp.lt.s32.totalorder (!%p139_p2), %s324_s14, 5 }
   0xb   : > { %v350_v0 = vmov 0.0   ;;  %v351_v1 = vmov 0   ;;  %v177_v2 = vld [vmem:[%s397_s2] sm:$0xf]  ;;  %s400_s14 = smov (!%p163_p3, %s324_s14), 5  ;;  %vm183_vm0 = vcmask 64512  }
   0xc   : > { %251 = vmatprep.mubr.f32.mxu0 %v350_v0  ;;  %341 = vset.pattern.permute.xlu0 %v351_v1  ;;  %s325_s17 = sshll.u32 %s400_s14, 3  ;;  %v174_v5 = vld [vmem:[%s396_s1] sm:$0xf]  ;;  %s327_s23 = sshll.u32 %s400_s14, 2 }
   0xd   : > { %180 = vperm.xlu0 %341, %v177_v2   ;;  %s166_s20 = scalar_lea.vmem %s395_s0, %s325_s17  ;;  %s172_s26 = scalar_lea.vmem %s398_s3, %s327_s23 }
   0xe   : > { %v176_v3 = vld [vmem:[%s166_s20 + $0x8] sm:$0xff]  ;;  %v175_v4 = vld [vmem:[%s166_s20] sm:$0xff] }
   0xf   : > { %217 = vmatprep.subr.mxu0 %v176_v3 }
  0x10   : > { %218 = vmatpush1.msra.mxu0 %v175_v4 }
  0x11   : > { %328 = vmatmul.mubr.msk.f32.vlgmr.msra.gmra.mxu0 %vm183_vm0, %v174_v5 }
  0x88   : > { %v181_v6 = vpop.permute.xlu0 %180 }
  0xd1   : > { %v253_v7 = vpop.f32.mrf.mxu0 }
  0xd2   : > { %v254_v9 = vadd.f32 %v253_v7, %v181_v6 }
  0xd3   : > { %v255_v8 = vpop.f32.mrf.mxu0 }
  0xd4   : > { %v256_v10 = vadd.f32 %v255_v8, %v181_v6 }
  0xd6   : > { %v260_v11 = vcombine.low %v254_v9, %v256_v10 }
  0xd8   : > { %262 = vst [vmem:[%s172_s26] sm:$0xff] %v260_v11 }
  0xd9 PF: > { %s13_s12 = sadd.s32 1, %s348_s12  }
  0xda   : > { %p10_p4 = scmp.ge.s32.totalorder %s13_s12, 5  }
  0xdc   :  { %12 = sbr.rel (!%p10_p4) target bundleno = 1 (0x1), region = 62 }

// kernel: _lambda_.37
= control target key start
LH: loop header
LB: loop body
LE: loop exit
PB: predicated region body
PF: predicated region fallthrough
CT: control target
= control target key end

     0   :  { %s794_s30 = smov 0   ;;  %s878_s0 = inlined_call_operand.vmem [shape: f32[4,256], index: 0, kind: input, shape index: {}]   ;;  %s879_s1 = inlined_call_operand.vmem [shape: f32[1,256], index: 1, kind: input, shape index: {}]   ;;  %s880_s2 = inlined_call_operand.vmem [shape: f32[4,1], index: 2, kind: input, shape index: {}]   ;;  %s881_s3 = inlined_call_operand.vmem [shape: f32[4,1], index: 3, kind: input, shape index: {}]   ;;  %s882_s4 = inlined_call_operand.vmem [shape: f32[32,4], index: 4, kind: input, shape index: {}]   ;;  %s883_s5 = inlined_call_operand.vmem [shape: f32[32,1], index: 5, kind: input, shape index: {}]   ;;  %s884_s6 = inlined_call_operand.vmem [shape: f32[32,1], index: 6, kind: input, shape index: {}]   ;;  %s885_s7 = inlined_call_operand.vmem [shape: f32[4,32], index: 7, kind: input, shape index: {}]   ;;  %s886_s8 = inlined_call_operand.vmem [shape: f32[4,1], index: 8, kind: input, shape index: {}]   ;;  %s887_s9 = inlined_call_operand.vmem [shape: f32[4,256], index: 9, kind: output, shape index: {}]  }
   0x1 LB: > { %s675_s10 = sadd.s32 4294967295, %s739_s30   ;;  %p679_p0 = scmp.ge.s32.totalorder %s739_s30, 1  ;;  %s739_s30 = sphi %s794_s30, %s19_s30  }
   0x2   : > { %p294_p1 = scmp.lt.s32.totalorder %s739_s30, 3 }
   0x4   : > { %p295_p2 = pnand %p679_p0, %p294_p1 }
   0x5   : > { %p331_p3 = scmp.lt.s32.totalorder (!%p295_p2), %s675_s10, 1 }
   0x6   : > { %298 = sbr.rel (%p295_p2) target bundleno = 551 (0x227), region = 56 }
   0xb   : > { %v343_v0 = vld [vmem:[%s880_s2] sm:$0xf]  ;;  %v741_v1 = vmov 0   ;;  %vm369_vm0 = vcmask 31744   ;;  %v502_v4 = vld [vmem:[%s884_s6 + $0x18] sm:$0xff]  ;;  %v501_v5 = vld [vmem:[%s884_s6 + $0x10] sm:$0xff] }
   0xc   : > { %731 = vset.pattern.permute.xlu0 %v741_v1  ;;  %732 = vset.pattern.permute.xlu1 %v741_v1  ;;  %v358_v2 = vld [vmem:[%s881_s3] sm:$0xf]  ;;  %v500_v6 = vld [vmem:[%s884_s6 + $0x8] sm:$0xff]  ;;  %v474_v7 = vld [vmem:[%s883_s5 + $0x18] sm:$0xff]  ;;  %s889_s10 = smov (!%p331_p3, %s675_s10), 1  ;;  %vm382_vm1 = vcmask 1043456  }
   0xd   : > { %347 = vperm.xlu0 %731, %v343_v0   ;;  %v365_v3 = vld [vmem:[%s882_s4] sm:$0xff]  ;;  %492 = vperm.xlu1 %732, %v474_v7   ;;  %v473_v9 = vld [vmem:[%s883_s5 + $0x10] sm:$0xff]  ;;  %v472_v10 = vld [vmem:[%s883_s5 + $0x8] sm:$0xff]  ;;  %s680_s16 = sshll.u32 %s889_s10, 2  ;;  %s337_s19 = scalar_lea.vmem %s879_s1, %s889_s10  ;;  %v742_v23 = vmov 0.0   ;;  %vm743_vm2 = vmmov 0  }
   0xe   : > { %703 = vmatprep.mubr.msk.f32.mxu0 %vm369_vm0, %v365_v3  ;;  %v532_v8 = vld [vmem:[%s886_s8] sm:$0xf]  ;;  %s334_s22 = scalar_lea.vmem %s878_s0, %s680_s16  ;;  %v366_v20 = vld [vmem:[%s882_s4 + $0x8] sm:$0xff]  ;;  %v367_v21 = vld [vmem:[%s882_s4 + $0x10] sm:$0xff]  ;;  %709 = vmatprep.subr.mxu1 %v742_v23  ;;  %vm538_vm3 = vcmask 261120   ;;  %s341_s14 = scalar_lea.vmem %s887_s9, %s680_s16 }
   0xf   : > { %v471_v11 = vld [vmem:[%s883_s5] sm:$0xff]  ;;  %v368_v22 = vld [vmem:[%s882_s4 + $0x18] sm:$0xff]  ;;  %717 = vmatprep.mubr.msk.f32.mxu1 %vm743_vm2, %v742_v23 }
  0x10   : > { %v499_v12 = vld [vmem:[%s884_s6] sm:$0xff] }
  0x11   : > { %361 = vperm.xlu0 %731, %v358_v2   ;;  %487 = vperm.xlu1 %732, %v473_v9   ;;  %v682_v13 = vld [vmem:[%s337_s19] ss:$0 sm:$0xff] }
  0x12   : > { %v342_v15 = vld [vmem:[%s334_s22] sm:$0xf] }
  0x13   : > { %v531_v48 = vld [vmem:[%s885_s7] sm:$0xf] }
  0x15   : > { %520 = vperm.xlu0 %731, %v502_v4   ;;  %482 = vperm.xlu1 %732, %v472_v10  }
  0x19   : > { %515 = vperm.xlu0 %731, %v501_v5   ;;  %477 = vperm.xlu1 %732, %v471_v11  }
  0x1d   : > { %510 = vperm.xlu0 %731, %v500_v6   ;;  %505 = vperm.xlu1 %732, %v499_v12  }
  0x21   : > { %535 = vperm.xlu0 %731, %v532_v8  }
  0x88   : > { %v348_v14 = vpop.permute.xlu0 %347  ;;  %v493_v24 = vpop.permute.xlu1 %492 }
  0x89   : > { %v356_v16 = vmul.f32 %v682_v13, %v348_v14 }
  0x8b   : > { %v357_v17 = vadd.f32 %v356_v16, %v342_v15 }
  0x8c   : > { %v362_v18 = vpop.permute.xlu0 %361  ;;  %v488_v25 = vpop.permute.xlu1 %487 }
  0x8d   : > { %v364_v19 = vadd.f32 %v362_v18, %v357_v17 }
  0x8f   : > { %701 = vmatprep.subr.msk.mxu0 %vm382_vm1, %v364_v19 }
  0x90   : > { %702 = vmatpush3.msk.msra.mxu0 %vm382_vm1, %v364_v19  ;;  %v521_v26 = vpop.permute.xlu0 %520  ;;  %v483_v27 = vpop.permute.xlu1 %482 }
  0x91   : > { %704 = vmatmul.mubr.msk.f32.vlgmr.msra.gmra.mxu0 %vm369_vm0, %v366_v20 }
  0x92   : > { %706 = vmatprep.mubr.msk.f32.mxu0 %vm369_vm0, %v367_v21 }
  0x94   : > { %v516_v29 = vpop.permute.xlu0 %515  ;;  %v478_v31 = vpop.permute.xlu1 %477 }
  0x95   : > { %707 = vmatmul.mubr.msk.f32.gmra.mxu0 %vm369_vm0, %v368_v22 }
  0x98   : > { %v511_v39 = vpop.permute.xlu0 %510  ;;  %v506_v43 = vpop.permute.xlu1 %505 }
  0x9c   : > { %v536_v49 = vpop.permute.xlu0 %535 }
 0x151   : > { %v705_v28 = vpop.f32.mrf.mxu0 }
 0x152   : > { %v496_v33 = vmul.f32 %v705_v28, %v483_v27 }
 0x153   : > { %v452_v30 = vpop.f32.mrf.mxu0 }
 0x154   : > { %v495_v36 = vmul.f32 %v478_v31, %v452_v30  ;;  %v524_v40 = vadd.f32 %v511_v39, %v496_v33 }
 0x155   : > { %v708_v32 = vpop.f32.mrf.mxu0 }
 0x156   : > { %v498_v34 = vmul.f32 %v708_v32, %v493_v24  ;;  %v523_v44 = vadd.f32 %v506_v43, %v495_v36  ;;  %v528_v46 = vmax.f32 %v524_v40, 0.0 }
 0x157   : > { %v462_v35 = vpop.f32.mrf.mxu0 }
 0x158   : > { %v497_v37 = vmul.f32 %v488_v25, %v462_v35  ;;  %v526_v38 = vadd.f32 %v521_v26, %v498_v34  ;;  %v527_v47 = vmax.f32 %v523_v44, 0.0 }
 0x15a   : > { %v525_v41 = vadd.f32 %v516_v29, %v497_v37  ;;  %v530_v42 = vmax.f32 %v526_v38, 0.0 }
 0x15c   : > { %v529_v45 = vmax.f32 %v525_v41, 0.0  ;;  %710 = vmatpush3.msra.mxu1 %v530_v42 }
 0x15d   : > { %711 = vmatprep.subr.mxu1 %v742_v23 }
 0x15e   : > { %712 = vmatpush3.msra.mxu1 %v529_v45 }
 0x15f   : > { %713 = vmatprep.subr.mxu1 %v742_v23 }
 0x160   : > { %714 = vmatpush3.msra.mxu1 %v528_v46 }
 0x161   : > { %715 = vmatprep.subr.mxu1 %v742_v23 }
 0x162   : > { %716 = vmatpush3.msra.mxu1 %v527_v47 }
 0x163   : > { %718 = vmatmul.mubr.msk.f32.vlgmr.msra.gmra.mxu1 %vm538_vm3, %v531_v48 }
 0x223   : > { %v608_v50 = vpop.f32.mrf.mxu1 }
 0x224   : > { %v609_v51 = vadd.f32 %v608_v50, %v536_v49 }
 0x225   : > { %v719_v52 = vpop.f32.mrf.mxu1 }
 0x226   : > { %612 = vst [vmem:[%s341_s14] sm:$0xf] %v609_v51 }
 0x227 PF: > { %s19_s30 = sadd.s32 1, %s739_s30  }
 0x228   : > { %p16_p4 = scmp.ge.s32.totalorder %s19_s30, 4  }
 0x22a   :  { %18 = sbr.rel (!%p16_p4) target bundleno = 1 (0x1), region = 89 }

</bundles_post_ra>
